<compile_context>
chip_gen: v6e
topology: v6e:2x2x1
jax: 0.10.0
libtpu: 0.0.40
codegen_flags: <defaults>
</compile_context>

<pallas_src>
import jax
import jax.numpy as jnp
from jax.experimental import pallas as pl
from jax.experimental.pallas import tpu as pltpu


# ----------------------------------------------------------------------------
# Pallas kernels
# ----------------------------------------------------------------------------
def _linear_kernel(x_ref, w_ref, b_ref, o_ref):
    """Row-tiled dense layer: o = x @ w + b."""
    o_ref[...] = (jnp.dot(x_ref[...], w_ref[...],
                          preferred_element_type=jnp.float32) + b_ref[...])


def _lstm_dir_kernel(gx_ref, whh_ref, out_ref):
    """Full recurrence of ONE LSTM direction.  Grid = (direction,).

    gx  : (S, B, 4H)  precomputed x @ W_ih^T + (b_ih + b_hh) for this direction
    whh : (H, 4H)     recurrent weight (pre-transposed)
    out : (S, B, H)
    """
    d = pl.program_id(0)                      # 0 = forward, 1 = backward
    S, B, H4 = gx_ref.shape
    H = H4 // 4
    whh = whh_ref[...]                        # loaded once, lives in vregs

    def step(i, carry):
        h, c = carry
        t = i + d * (S - 1 - 2 * i)           # fwd: i ; bwd: S-1-i  (scalar arith only)
        gates = gx_ref[t] + jnp.dot(h, whh, preferred_element_type=jnp.float32)
        # PyTorch gate order: i, f, g, o.  i|f are contiguous -> one sigmoid pass.
        i_f = jax.nn.sigmoid(gates[:, :2 * H])
        g = jnp.tanh(gates[:, 2 * H:3 * H])
        o = jax.nn.sigmoid(gates[:, 3 * H:])
        c_new = i_f[:, H:] * c + i_f[:, :H] * g
        h_new = o * jnp.tanh(c_new)
        out_ref[t] = h_new
        return h_new, c_new

    zeros = jnp.zeros((B, H), jnp.float32)
    jax.lax.fori_loop(0, S, step, (zeros, zeros),
                      unroll=True if S <= 16 else 8)


# ----------------------------------------------------------------------------
# Wrappers
# ----------------------------------------------------------------------------
def linear(x, w_t, b, *, tile_rows=512):
    """x: (N, In); w_t: (In, Out) pre-transposed; b: (Out,) -> (N, Out)."""
    N, In = x.shape
    Out = w_t.shape[-1]
    tn = min(N, tile_rows)
    return pl.pallas_call(
        _linear_kernel,
        out_shape=jax.ShapeDtypeStruct((N, Out), jnp.float32),
        grid=(pl.cdiv(N, tn),),
        in_specs=[
            pl.BlockSpec((tn, In), lambda r: (r, 0)),
            pl.BlockSpec((In, Out), lambda r: (0, 0)),
            pl.BlockSpec((1, Out), lambda r: (0, 0)),
        ],
        out_specs=pl.BlockSpec((tn, Out), lambda r: (r, 0)),
        compiler_params=pltpu.CompilerParams(
            dimension_semantics=("parallel",)),
    )(x, w_t, b.reshape(1, Out))


def bilstm_layer(x_tm, wih_t, whh_t, b):
    """One bidirectional LSTM layer, time-major.

    x_tm  : (S, B, In)
    wih_t : (In, 8H)   both directions concatenated along the output (lane) dim
    whh_t : (2, H, 4H) per-direction recurrent weights, pre-transposed
    b     : (8H,)      b_ih + b_hh, both directions concatenated
    returns (S, B, 2H)
    """
    S, B, In = x_tm.shape
    H4 = whh_t.shape[-1]
    H = H4 // 4

    # ---- hoisted, time-parallel input projection (both directions, one matmul) ----
    gates_x = linear(x_tm.reshape(S * B, In), wih_t, b).reshape(S, B, 2 * H4)

    # ---- recurrence: grid over directions only; time loop inside the kernel -------
    lstm_out = pl.pallas_call(
        _lstm_dir_kernel,
        out_shape=jax.ShapeDtypeStruct((2, S, B, H), jnp.float32),
        grid=(2,),
        in_specs=[
            # lane-block d of the (S, B, 8H) projection -> this direction's gates
            pl.BlockSpec((S, B, H4), lambda d: (0, 0, d)),
            pl.BlockSpec((None, H, H4), lambda d: (d, 0, 0)),
        ],
        out_specs=pl.BlockSpec((None, S, B, H), lambda d: (d, 0, 0, 0)),
        compiler_params=pltpu.CompilerParams(
            dimension_semantics=("parallel",)),
    )(gates_x, whh_t)

    # PyTorch bidirectional layout: concat(fwd, bwd) along the feature dim.
    return jnp.concatenate([lstm_out[0], lstm_out[1]], axis=-1)   # (S, B, 2H)


# ----------------------------------------------------------------------------
# Full NeuralDependencyParser forward (multi=False)
# ----------------------------------------------------------------------------
def neural_dep_parser_forward(params, features, tokens, tags):
    """features: int (S, B, hidden*feature_num); tokens/tags: int (S, B)."""
    # Embedding lookups + concat (plain-JAX glue).
    w_e = jnp.take(params["w_embed"], tokens, axis=0)             # (S, B, Dw)
    t_e = jnp.take(params["t_embed"], tags, axis=0)               # (S, B, Dt)
    h = jnp.concatenate([w_e, t_e], axis=-1)                      # (S, B, Dw+Dt)

    # Multi-layer bidirectional LSTM (time-major, batch_first=False).
    for layer in params["lstm"]:
        h = bilstm_layer(h, layer["wih_t"], layer["whh_t"], layer["b"])
    encode = h                                                    # (S, B, hidden)

    # torch.gather(encode, dim=-1, index=features)  (plain-JAX glue).
    gathered = jnp.take_along_axis(encode, features, axis=-1)     # (S, B, hid*feat)

    S, B, K = gathered.shape
    pred = linear(gathered.reshape(S * B, K), params["out_w_t"], params["out_b"])
    return pred.reshape(S, B, -1)                                 # (S, B, label_size)


# ----------------------------------------------------------------------------
# Deterministic parameter initialization (weights stored pre-transposed/stacked)
# ----------------------------------------------------------------------------
def _uniform(key, shape, scale):
    return jax.random.uniform(key, shape, jnp.float32, -scale, scale)


def init_params(key, w_size, w_dim, t_size, t_dim, hidden_size, label_size,
                layer_num, feature_num, scope=1.0):
    H = hidden_size // 2
    params = {}
    key, k1, k2 = jax.random.split(key, 3)
    params["w_embed"] = _uniform(k1, (w_size, w_dim), scope)
    params["t_embed"] = _uniform(k2, (t_size, t_dim), scope)

    layers = []
    in_size = w_dim + t_dim
    lstm_scale = 1.0 / (H ** 0.5)            # PyTorch LSTM default init range
    for _ in range(layer_num):
        wih_l, whh_l, b_l = [], [], []
        for _d in range(2):                  # fwd, bwd
            key, ka, kb, kc, kd = jax.random.split(key, 5)
            w_ih = _uniform(ka, (4 * H, in_size), lstm_scale)
            w_hh = _uniform(kb, (4 * H, H), lstm_scale)
            b_ih = _uniform(kc, (4 * H,), lstm_scale)
            b_hh = _uniform(kd, (4 * H,), lstm_scale)
            wih_l.append(w_ih.T)                             # (In, 4H)
            whh_l.append(w_hh.T)                             # (H, 4H)
            b_l.append(b_ih + b_hh)                          # (4H,)
        layers.append(dict(
            wih_t=jnp.concatenate(wih_l, axis=-1),           # (In, 8H)  dirs on lanes
            whh_t=jnp.stack(whh_l, axis=0),                  # (2, H, 4H)
            b=jnp.concatenate(b_l, axis=-1),                 # (8H,)
        ))
        in_size = hidden_size
    params["lstm"] = layers

    out_in = hidden_size * feature_num
    out_scale = 1.0 / (out_in ** 0.5)
    key, k3, k4 = jax.random.split(key, 3)
    params["out_w_t"] = _uniform(k3, (label_size, out_in), out_scale).T   # (out_in, L)
    params["out_b"] = _uniform(k4, (label_size,), out_scale)
    return key, params


# ----------------------------------------------------------------------------
if __name__ == "__main__":
    W_SIZE, W_DIM = 50, 16
    T_SIZE, T_DIM = 12, 8
    HIDDEN = 64              # bidirectional output size (H = 32 per direction, 4H = 128)
    LABELS = 8
    LAYERS = 2
    FEATURE_NUM = 2
    S, B = 8, 2

    key = jax.random.PRNGKey(0)
    key, params = init_params(key, W_SIZE, W_DIM, T_SIZE, T_DIM,
                              HIDDEN, LABELS, LAYERS, FEATURE_NUM)

    key, kt, kg, kf = jax.random.split(key, 4)
    tokens = jax.random.randint(kt, (S, B), 0, W_SIZE, dtype=jnp.int32)
    tags = jax.random.randint(kg, (S, B), 0, T_SIZE, dtype=jnp.int32)
    # torch.gather index along the hidden dim: values in [0, HIDDEN)
    features = jax.random.randint(kf, (S, B, HIDDEN * FEATURE_NUM), 0, HIDDEN,
                                  dtype=jnp.int32)

    fwd = jax.jit(lambda f, tok, tg: neural_dep_parser_forward(params, f, tok, tg))
    out = jax.block_until_ready(fwd(features, tokens, tags))

    assert out.shape == (S, B, LABELS), out.shape
    assert bool(jnp.all(jnp.isfinite(out)))
    print("KERNEL_OK")
</pallas_src>

<mosaic_0001>
module attributes {stable_mosaic.version = 11 : i64} {
  func.func @_linear_kernel(%arg0: i32, %arg1: memref<16x24xf32, #tpu.memory_space<vmem>>, %arg2: memref<24x256xf32, #tpu.memory_space<vmem>>, %arg3: memref<1x256xf32, #tpu.memory_space<vmem>>, %arg4: memref<16x256xf32, #tpu.memory_space<vmem>>) attributes {dimension_semantics = [#tpu.dimension_semantics<parallel>], iteration_bounds = array<i64: 1>, scalar_prefetch = 0 : i64, scratch_operands = 0 : i64, tpu.core_type = #tpu.core_type<tc>, window_params = [{transform_indices = @transform_0, window_bounds = array<i64: 16, 24>}, {pipeline_mode = #tpu.pipeline_mode<synchronous>, transform_indices = @transform_1, window_bounds = array<i64: 24, 256>}, {pipeline_mode = #tpu.pipeline_mode<synchronous>, transform_indices = @transform_2, window_bounds = array<i64: 1, 256>}, {transform_indices = @transform_3, window_bounds = array<i64: 16, 256>}]} {
    %c0 = arith.constant 0 : index
    %c0_0 = arith.constant 0 : index
    %0 = vector.load %arg1[%c0, %c0_0] : memref<16x24xf32, #tpu.memory_space<vmem>>, vector<16x24xf32>
    %c0_1 = arith.constant 0 : index
    %c0_2 = arith.constant 0 : index
    %1 = vector.load %arg2[%c0_1, %c0_2] : memref<24x256xf32, #tpu.memory_space<vmem>>, vector<24x256xf32>
    %cst = arith.constant dense<0.000000e+00> : vector<16x256xf32>
    %2 = tpu.matmul %0, %1, %cst {dimension_numbers = #tpu.dot_dimension_numbers<[1], [0], [0], [1], [0, 0, 1, 1], [], []>} : vector<16x24xf32>, vector<24x256xf32>, vector<16x256xf32> -> vector<16x256xf32>
    %c0_3 = arith.constant 0 : index
    %c0_4 = arith.constant 0 : index
    %3 = vector.load %arg3[%c0_3, %c0_4] : memref<1x256xf32, #tpu.memory_space<vmem>>, vector<1x256xf32>
    %4 = vector.broadcast %3 : vector<1x256xf32> to vector<16x256xf32>
    %5 = arith.addf %2, %4 : vector<16x256xf32>
    %c0_5 = arith.constant 0 : index
    %c0_6 = arith.constant 0 : index
    %6 = vector.load %arg4[%c0_5, %c0_6] : memref<16x256xf32, #tpu.memory_space<vmem>>, vector<16x256xf32>
    tpu.vector_store %arg4[%c0_5, %c0_6], %5 {strides = array<i32>} : memref<16x256xf32, #tpu.memory_space<vmem>>, vector<16x256xf32>,
    return
  }
  func.func @transform_0(%arg0: i32) -> (i32, i32) {
    %c0_i32 = arith.constant 0 : i32
    %c0_i32_0 = arith.constant 0 : i32
    return %arg0, %c0_i32 : i32, i32
  }
  func.func @transform_1(%arg0: i32) -> (i32, i32) {
    %c0_i32 = arith.constant 0 : i32
    %c0_i32_0 = arith.constant 0 : i32
    %c0_i32_1 = arith.constant 0 : i32
    return %c0_i32, %c0_i32_0 : i32, i32
  }
  func.func @transform_2(%arg0: i32) -> (i32, i32) {
    %c0_i32 = arith.constant 0 : i32
    %c0_i32_0 = arith.constant 0 : i32
    %c0_i32_1 = arith.constant 0 : i32
    return %c0_i32, %c0_i32_0 : i32, i32
  }
  func.func @transform_3(%arg0: i32) -> (i32, i32) {
    %c0_i32 = arith.constant 0 : i32
    %c0_i32_0 = arith.constant 0 : i32
    return %arg0, %c0_i32 : i32, i32
  }
}

module attributes {stable_mosaic.version = 11 : i64} {
  func.func @_lstm_dir_kernel(%arg0: i32, %arg1: memref<8x2x128xf32, #tpu.memory_space<vmem>>, %arg2: memref<1x32x128xf32, #tpu.memory_space<vmem>>, %arg3: memref<1x8x2x32xf32, #tpu.memory_space<vmem>>) attributes {dimension_semantics = [#tpu.dimension_semantics<parallel>], iteration_bounds = array<i64: 2>, scalar_prefetch = 0 : i64, scratch_operands = 0 : i64, tpu.core_type = #tpu.core_type<tc>, window_params = [{transform_indices = @transform_0, window_bounds = array<i64: 8, 2, 128>}, {transform_indices = @transform_1, window_bounds = array<i64: 1, 32, 128>}, {transform_indices = @transform_2, window_bounds = array<i64: 1, 8, 2, 32>}]} {
    %c0 = arith.constant 0 : index
    %c0_0 = arith.constant 0 : index
    %c0_1 = arith.constant 0 : index
    %0 = vector.load %arg2[%c0, %c0_0, %c0_1] : memref<1x32x128xf32, #tpu.memory_space<vmem>>, vector<1x32x128xf32>
    %1 = vector.shape_cast %0 : vector<1x32x128xf32> to vector<32x128xf32>
    %cst = arith.constant 0.000000e+00 : f32
    %2 = vector.broadcast %cst : f32 to vector<2x32xf32>
    %c0_i32 = arith.constant 0 : i32
    %c2_i32 = arith.constant 2 : i32
    %3 = arith.muli %c2_i32, %c0_i32 : i32
    %c7_i32 = arith.constant 7 : i32
    %4 = arith.subi %c7_i32, %3 : i32
    %5 = arith.muli %arg0, %4 : i32
    %6 = arith.addi %c0_i32, %5 : i32
    %7 = arith.index_cast %6 : i32 to index
    %c0_2 = arith.constant 0 : index
    %c0_3 = arith.constant 0 : index
    %8 = vector.load %arg1[%7, %c0_2, %c0_3] : memref<8x2x128xf32, #tpu.memory_space<vmem>>, vector<1x2x128xf32>
    %9 = vector.shape_cast %8 : vector<1x2x128xf32> to vector<2x128xf32>
    %cst_4 = arith.constant dense<0.000000e+00> : vector<2x128xf32>
    %10 = tpu.matmul %2, %1, %cst_4 {dimension_numbers = #tpu.dot_dimension_numbers<[1], [0], [0], [1], [0, 0, 1, 1], [], []>} : vector<2x32xf32>, vector<32x128xf32>, vector<2x128xf32> -> vector<2x128xf32>
    %11 = arith.addf %9, %10 : vector<2x128xf32>
    %12 = vector.extract_strided_slice %11 {offsets = [0, 0], sizes = [2, 64], strides = [1, 1]} : vector<2x128xf32> to vector<2x64xf32>
    %13 = arith.negf %12 : vector<2x64xf32>
    %14 = math.exp %13 : vector<2x64xf32>
    %cst_5 = arith.constant 1.000000e+00 : f32
    %15 = vector.broadcast %cst_5 : f32 to vector<2x64xf32>
    %16 = arith.addf %15, %14 : vector<2x64xf32>
    %17 = arith.divf %15, %16 : vector<2x64xf32>
    %18 = vector.extract_strided_slice %11 {offsets = [0, 64], sizes = [2, 32], strides = [1, 1]} : vector<2x128xf32> to vector<2x32xf32>
    %19 = math.tanh %18 : vector<2x32xf32>
    %20 = vector.extract_strided_slice %11 {offsets = [0, 96], sizes = [2, 32], strides = [1, 1]} : vector<2x128xf32> to vector<2x32xf32>
    %21 = arith.negf %20 : vector<2x32xf32>
    %22 = math.exp %21 : vector<2x32xf32>
    %cst_6 = arith.constant 1.000000e+00 : f32
    %23 = vector.broadcast %cst_6 : f32 to vector<2x32xf32>
    %24 = arith.addf %23, %22 : vector<2x32xf32>
    %25 = arith.divf %23, %24 : vector<2x32xf32>
    %26 = vector.extract_strided_slice %17 {offsets = [0, 32], sizes = [2, 32], strides = [1, 1]} : vector<2x64xf32> to vector<2x32xf32>
    %27 = arith.mulf %26, %2 : vector<2x32xf32>
    %28 = vector.extract_strided_slice %17 {offsets = [0, 0], sizes = [2, 32], strides = [1, 1]} : vector<2x64xf32> to vector<2x32xf32>
    %29 = arith.mulf %28, %19 : vector<2x32xf32>
    %30 = arith.addf %27, %29 : vector<2x32xf32>
    %31 = math.tanh %30 : vector<2x32xf32>
    %32 = arith.mulf %25, %31 : vector<2x32xf32>
    %c0_7 = arith.constant 0 : index
    %33 = arith.index_cast %6 : i32 to index
    %c0_8 = arith.constant 0 : index
    %c0_9 = arith.constant 0 : index
    %34 = vector.load %arg3[%c0_7, %33, %c0_8, %c0_9] : memref<1x8x2x32xf32, #tpu.memory_space<vmem>>, vector<1x1x2x32xf32>
    %35 = vector.shape_cast %34 : vector<1x1x2x32xf32> to vector<2x32xf32>
    %36 = vector.shape_cast %32 : vector<2x32xf32> to vector<1x1x2x32xf32>
    tpu.vector_store %arg3[%c0_7, %33, %c0_8, %c0_9], %36 {strides = array<i32>} : memref<1x8x2x32xf32, #tpu.memory_space<vmem>>, vector<1x1x2x32xf32>,
    %c1_i32 = arith.constant 1 : i32
    %c2_i32_10 = arith.constant 2 : i32
    %37 = arith.muli %c2_i32_10, %c1_i32 : i32
    %c7_i32_11 = arith.constant 7 : i32
    %38 = arith.subi %c7_i32_11, %37 : i32
    %39 = arith.muli %arg0, %38 : i32
    %40 = arith.addi %c1_i32, %39 : i32
    %41 = arith.index_cast %40 : i32 to index
    %c0_12 = arith.constant 0 : index
    %c0_13 = arith.constant 0 : index
    %42 = vector.load %arg1[%41, %c0_12, %c0_13] : memref<8x2x128xf32, #tpu.memory_space<vmem>>, vector<1x2x128xf32>
    %43 = vector.shape_cast %42 : vector<1x2x128xf32> to vector<2x128xf32>
    %cst_14 = arith.constant dense<0.000000e+00> : vector<2x128xf32>
    %44 = tpu.matmul %32, %1, %cst_14 {dimension_numbers = #tpu.dot_dimension_numbers<[1], [0], [0], [1], [0, 0, 1, 1], [], []>} : vector<2x32xf32>, vector<32x128xf32>, vector<2x128xf32> -> vector<2x128xf32>
    %45 = arith.addf %43, %44 : vector<2x128xf32>
    %46 = vector.extract_strided_slice %45 {offsets = [0, 0], sizes = [2, 64], strides = [1, 1]} : vector<2x128xf32> to vector<2x64xf32>
    %47 = arith.negf %46 : vector<2x64xf32>
    %48 = math.exp %47 : vector<2x64xf32>
    %cst_15 = arith.constant 1.000000e+00 : f32
    %49 = vector.broadcast %cst_15 : f32 to vector<2x64xf32>
    %50 = arith.addf %49, %48 : vector<2x64xf32>
    %51 = arith.divf %49, %50 : vector<2x64xf32>
    %52 = vector.extract_strided_slice %45 {offsets = [0, 64], sizes = [2, 32], strides = [1, 1]} : vector<2x128xf32> to vector<2x32xf32>
    %53 = math.tanh %52 : vector<2x32xf32>
    %54 = vector.extract_strided_slice %45 {offsets = [0, 96], sizes = [2, 32], strides = [1, 1]} : vector<2x128xf32> to vector<2x32xf32>
    %55 = arith.negf %54 : vector<2x32xf32>
    %56 = math.exp %55 : vector<2x32xf32>
    %cst_16 = arith.constant 1.000000e+00 : f32
    %57 = vector.broadcast %cst_16 : f32 to vector<2x32xf32>
    %58 = arith.addf %57, %56 : vector<2x32xf32>
    %59 = arith.divf %57, %58 : vector<2x32xf32>
    %60 = vector.extract_strided_slice %51 {offsets = [0, 32], sizes = [2, 32], strides = [1, 1]} : vector<2x64xf32> to vector<2x32xf32>
    %61 = arith.mulf %60, %30 : vector<2x32xf32>
    %62 = vector.extract_strided_slice %51 {offsets = [0, 0], sizes = [2, 32], strides = [1, 1]} : vector<2x64xf32> to vector<2x32xf32>
    %63 = arith.mulf %62, %53 : vector<2x32xf32>
    %64 = arith.addf %61, %63 : vector<2x32xf32>
    %65 = math.tanh %64 : vector<2x32xf32>
    %66 = arith.mulf %59, %65 : vector<2x32xf32>
    %c0_17 = arith.constant 0 : index
    %67 = arith.index_cast %40 : i32 to index
    %c0_18 = arith.constant 0 : index
    %c0_19 = arith.constant 0 : index
    %68 = vector.load %arg3[%c0_17, %67, %c0_18, %c0_19] : memref<1x8x2x32xf32, #tpu.memory_space<vmem>>, vector<1x1x2x32xf32>
    %69 = vector.shape_cast %68 : vector<1x1x2x32xf32> to vector<2x32xf32>
    %70 = vector.shape_cast %66 : vector<2x32xf32> to vector<1x1x2x32xf32>
    tpu.vector_store %arg3[%c0_17, %67, %c0_18, %c0_19], %70 {strides = array<i32>} : memref<1x8x2x32xf32, #tpu.memory_space<vmem>>, vector<1x1x2x32xf32>,
    %c2_i32_20 = arith.constant 2 : i32
    %c2_i32_21 = arith.constant 2 : i32
    %71 = arith.muli %c2_i32_21, %c2_i32_20 : i32
    %c7_i32_22 = arith.constant 7 : i32
    %72 = arith.subi %c7_i32_22, %71 : i32
    %73 = arith.muli %arg0, %72 : i32
    %74 = arith.addi %c2_i32_20, %73 : i32
    %75 = arith.index_cast %74 : i32 to index
    %c0_23 = arith.constant 0 : index
    %c0_24 = arith.constant 0 : index
    %76 = vector.load %arg1[%75, %c0_23, %c0_24] : memref<8x2x128xf32, #tpu.memory_space<vmem>>, vector<1x2x128xf32>
    %77 = vector.shape_cast %76 : vector<1x2x128xf32> to vector<2x128xf32>
    %cst_25 = arith.constant dense<0.000000e+00> : vector<2x128xf32>
    %78 = tpu.matmul %66, %1, %cst_25 {dimension_numbers = #tpu.dot_dimension_numbers<[1], [0], [0], [1], [0, 0, 1, 1], [], []>} : vector<2x32xf32>, vector<32x128xf32>, vector<2x128xf32> -> vector<2x128xf32>
    %79 = arith.addf %77, %78 : vector<2x128xf32>
    %80 = vector.extract_strided_slice %79 {offsets = [0, 0], sizes = [2, 64], strides = [1, 1]} : vector<2x128xf32> to vector<2x64xf32>
    %81 = arith.negf %80 : vector<2x64xf32>
    %82 = math.exp %81 : vector<2x64xf32>
    %cst_26 = arith.constant 1.000000e+00 : f32
    %83 = vector.broadcast %cst_26 : f32 to vector<2x64xf32>
    %84 = arith.addf %83, %82 : vector<2x64xf32>
    %85 = arith.divf %83, %84 : vector<2x64xf32>
    %86 = vector.extract_strided_slice %79 {offsets = [0, 64], sizes = [2, 32], strides = [1, 1]} : vector<2x128xf32> to vector<2x32xf32>
    %87 = math.tanh %86 : vector<2x32xf32>
    %88 = vector.extract_strided_slice %79 {offsets = [0, 96], sizes = [2, 32], strides = [1, 1]} : vector<2x128xf32> to vector<2x32xf32>
    %89 = arith.negf %88 : vector<2x32xf32>
    %90 = math.exp %89 : vector<2x32xf32>
    %cst_27 = arith.constant 1.000000e+00 : f32
    %91 = vector.broadcast %cst_27 : f32 to vector<2x32xf32>
    %92 = arith.addf %91, %90 : vector<2x32xf32>
    %93 = arith.divf %91, %92 : vector<2x32xf32>
    %94 = vector.extract_strided_slice %85 {offsets = [0, 32], sizes = [2, 32], strides = [1, 1]} : vector<2x64xf32> to vector<2x32xf32>
    %95 = arith.mulf %94, %64 : vector<2x32xf32>
    %96 = vector.extract_strided_slice %85 {offsets = [0, 0], sizes = [2, 32], strides = [1, 1]} : vector<2x64xf32> to vector<2x32xf32>
    %97 = arith.mulf %96, %87 : vector<2x32xf32>
    %98 = arith.addf %95, %97 : vector<2x32xf32>
    %99 = math.tanh %98 : vector<2x32xf32>
    %100 = arith.mulf %93, %99 : vector<2x32xf32>
    %c0_28 = arith.constant 0 : index
    %101 = arith.index_cast %74 : i32 to index
    %c0_29 = arith.constant 0 : index
    %c0_30 = arith.constant 0 : index
    %102 = vector.load %arg3[%c0_28, %101, %c0_29, %c0_30] : memref<1x8x2x32xf32, #tpu.memory_space<vmem>>, vector<1x1x2x32xf32>
    %103 = vector.shape_cast %102 : vector<1x1x2x32xf32> to vector<2x32xf32>
    %104 = vector.shape_cast %100 : vector<2x32xf32> to vector<1x1x2x32xf32>
    tpu.vector_store %arg3[%c0_28, %101, %c0_29, %c0_30], %104 {strides = array<i32>} : memref<1x8x2x32xf32, #tpu.memory_space<vmem>>, vector<1x1x2x32xf32>,
    %c3_i32 = arith.constant 3 : i32
    %c2_i32_31 = arith.constant 2 : i32
    %105 = arith.muli %c2_i32_31, %c3_i32 : i32
    %c7_i32_32 = arith.constant 7 : i32
    %106 = arith.subi %c7_i32_32, %105 : i32
    %107 = arith.muli %arg0, %106 : i32
    %108 = arith.addi %c3_i32, %107 : i32
    %109 = arith.index_cast %108 : i32 to index
    %c0_33 = arith.constant 0 : index
    %c0_34 = arith.constant 0 : index
    %110 = vector.load %arg1[%109, %c0_33, %c0_34] : memref<8x2x128xf32, #tpu.memory_space<vmem>>, vector<1x2x128xf32>
    %111 = vector.shape_cast %110 : vector<1x2x128xf32> to vector<2x128xf32>
    %cst_35 = arith.constant dense<0.000000e+00> : vector<2x128xf32>
    %112 = tpu.matmul %100, %1, %cst_35 {dimension_numbers = #tpu.dot_dimension_numbers<[1], [0], [0], [1], [0, 0, 1, 1], [], []>} : vector<2x32xf32>, vector<32x128xf32>, vector<2x128xf32> -> vector<2x128xf32>
    %113 = arith.addf %111, %112 : vector<2x128xf32>
    %114 = vector.extract_strided_slice %113 {offsets = [0, 0], sizes = [2, 64], strides = [1, 1]} : vector<2x128xf32> to vector<2x64xf32>
    %115 = arith.negf %114 : vector<2x64xf32>
    %116 = math.exp %115 : vector<2x64xf32>
    %cst_36 = arith.constant 1.000000e+00 : f32
    %117 = vector.broadcast %cst_36 : f32 to vector<2x64xf32>
    %118 = arith.addf %117, %116 : vector<2x64xf32>
    %119 = arith.divf %117, %118 : vector<2x64xf32>
    %120 = vector.extract_strided_slice %113 {offsets = [0, 64], sizes = [2, 32], strides = [1, 1]} : vector<2x128xf32> to vector<2x32xf32>
    %121 = math.tanh %120 : vector<2x32xf32>
    %122 = vector.extract_strided_slice %113 {offsets = [0, 96], sizes = [2, 32], strides = [1, 1]} : vector<2x128xf32> to vector<2x32xf32>
    %123 = arith.negf %122 : vector<2x32xf32>
    %124 = math.exp %123 : vector<2x32xf32>
    %cst_37 = arith.constant 1.000000e+00 : f32
    %125 = vector.broadcast %cst_37 : f32 to vector<2x32xf32>
    %126 = arith.addf %125, %124 : vector<2x32xf32>
    %127 = arith.divf %125, %126 : vector<2x32xf32>
    %128 = vector.extract_strided_slice %119 {offsets = [0, 32], sizes = [2, 32], strides = [1, 1]} : vector<2x64xf32> to vector<2x32xf32>
    %129 = arith.mulf %128, %98 : vector<2x32xf32>
    %130 = vector.extract_strided_slice %119 {offsets = [0, 0], sizes = [2, 32], strides = [1, 1]} : vector<2x64xf32> to vector<2x32xf32>
    %131 = arith.mulf %130, %121 : vector<2x32xf32>
    %132 = arith.addf %129, %131 : vector<2x32xf32>
    %133 = math.tanh %132 : vector<2x32xf32>
    %134 = arith.mulf %127, %133 : vector<2x32xf32>
    %c0_38 = arith.constant 0 : index
    %135 = arith.index_cast %108 : i32 to index
    %c0_39 = arith.constant 0 : index
    %c0_40 = arith.constant 0 : index
    %136 = vector.load %arg3[%c0_38, %135, %c0_39, %c0_40] : memref<1x8x2x32xf32, #tpu.memory_space<vmem>>, vector<1x1x2x32xf32>
    %137 = vector.shape_cast %136 : vector<1x1x2x32xf32> to vector<2x32xf32>
    %138 = vector.shape_cast %134 : vector<2x32xf32> to vector<1x1x2x32xf32>
    tpu.vector_store %arg3[%c0_38, %135, %c0_39, %c0_40], %138 {strides = array<i32>} : memref<1x8x2x32xf32, #tpu.memory_space<vmem>>, vector<1x1x2x32xf32>,
    %c4_i32 = arith.constant 4 : i32
    %c2_i32_41 = arith.constant 2 : i32
    %139 = arith.muli %c2_i32_41, %c4_i32 : i32
    %c7_i32_42 = arith.constant 7 : i32
    %140 = arith.subi %c7_i32_42, %139 : i32
    %141 = arith.muli %arg0, %140 : i32
    %142 = arith.addi %c4_i32, %141 : i32
    %143 = arith.index_cast %142 : i32 to index
    %c0_43 = arith.constant 0 : index
    %c0_44 = arith.constant 0 : index
    %144 = vector.load %arg1[%143, %c0_43, %c0_44] : memref<8x2x128xf32, #tpu.memory_space<vmem>>, vector<1x2x128xf32>
    %145 = vector.shape_cast %144 : vector<1x2x128xf32> to vector<2x128xf32>
    %cst_45 = arith.constant dense<0.000000e+00> : vector<2x128xf32>
    %146 = tpu.matmul %134, %1, %cst_45 {dimension_numbers = #tpu.dot_dimension_numbers<[1], [0], [0], [1], [0, 0, 1, 1], [], []>} : vector<2x32xf32>, vector<32x128xf32>, vector<2x128xf32> -> vector<2x128xf32>
    %147 = arith.addf %145, %146 : vector<2x128xf32>
    %148 = vector.extract_strided_slice %147 {offsets = [0, 0], sizes = [2, 64], strides = [1, 1]} : vector<2x128xf32> to vector<2x64xf32>
    %149 = arith.negf %148 : vector<2x64xf32>
    %150 = math.exp %149 : vector<2x64xf32>
    %cst_46 = arith.constant 1.000000e+00 : f32
    %151 = vector.broadcast %cst_46 : f32 to vector<2x64xf32>
    %152 = arith.addf %151, %150 : vector<2x64xf32>
    %153 = arith.divf %151, %152 : vector<2x64xf32>
    %154 = vector.extract_strided_slice %147 {offsets = [0, 64], sizes = [2, 32], strides = [1, 1]} : vector<2x128xf32> to vector<2x32xf32>
    %155 = math.tanh %154 : vector<2x32xf32>
    %156 = vector.extract_strided_slice %147 {offsets = [0, 96], sizes = [2, 32], strides = [1, 1]} : vector<2x128xf32> to vector<2x32xf32>
    %157 = arith.negf %156 : vector<2x32xf32>
    %158 = math.exp %157 : vector<2x32xf32>
    %cst_47 = arith.constant 1.000000e+00 : f32
    %159 = vector.broadcast %cst_47 : f32 to vector<2x32xf32>
    %160 = arith.addf %159, %158 : vector<2x32xf32>
    %161 = arith.divf %159, %160 : vector<2x32xf32>
    %162 = vector.extract_strided_slice %153 {offsets = [0, 32], sizes = [2, 32], strides = [1, 1]} : vector<2x64xf32> to vector<2x32xf32>
    %163 = arith.mulf %162, %132 : vector<2x32xf32>
    %164 = vector.extract_strided_slice %153 {offsets = [0, 0], sizes = [2, 32], strides = [1, 1]} : vector<2x64xf32> to vector<2x32xf32>
    %165 = arith.mulf %164, %155 : vector<2x32xf32>
    %166 = arith.addf %163, %165 : vector<2x32xf32>
    %167 = math.tanh %166 : vector<2x32xf32>
    %168 = arith.mulf %161, %167 : vector<2x32xf32>
    %c0_48 = arith.constant 0 : index
    %169 = arith.index_cast %142 : i32 to index
    %c0_49 = arith.constant 0 : index
    %c0_50 = arith.constant 0 : index
    %170 = vector.load %arg3[%c0_48, %169, %c0_49, %c0_50] : memref<1x8x2x32xf32, #tpu.memory_space<vmem>>, vector<1x1x2x32xf32>
    %171 = vector.shape_cast %170 : vector<1x1x2x32xf32> to vector<2x32xf32>
    %172 = vector.shape_cast %168 : vector<2x32xf32> to vector<1x1x2x32xf32>
    tpu.vector_store %arg3[%c0_48, %169, %c0_49, %c0_50], %172 {strides = array<i32>} : memref<1x8x2x32xf32, #tpu.memory_space<vmem>>, vector<1x1x2x32xf32>,
    %c5_i32 = arith.constant 5 : i32
    %c2_i32_51 = arith.constant 2 : i32
    %173 = arith.muli %c2_i32_51, %c5_i32 : i32
    %c7_i32_52 = arith.constant 7 : i32
    %174 = arith.subi %c7_i32_52, %173 : i32
    %175 = arith.muli %arg0, %174 : i32
    %176 = arith.addi %c5_i32, %175 : i32
    %177 = arith.index_cast %176 : i32 to index
    %c0_53 = arith.constant 0 : index
    %c0_54 = arith.constant 0 : index
    %178 = vector.load %arg1[%177, %c0_53, %c0_54] : memref<8x2x128xf32, #tpu.memory_space<vmem>>, vector<1x2x128xf32>
    %179 = vector.shape_cast %178 : vector<1x2x128xf32> to vector<2x128xf32>
    %cst_55 = arith.constant dense<0.000000e+00> : vector<2x128xf32>
    %180 = tpu.matmul %168, %1, %cst_55 {dimension_numbers = #tpu.dot_dimension_numbers<[1], [0], [0], [1], [0, 0, 1, 1], [], []>} : vector<2x32xf32>, vector<32x128xf32>, vector<2x128xf32> -> vector<2x128xf32>
    %181 = arith.addf %179, %180 : vector<2x128xf32>
    %182 = vector.extract_strided_slice %181 {offsets = [0, 0], sizes = [2, 64], strides = [1, 1]} : vector<2x128xf32> to vector<2x64xf32>
    %183 = arith.negf %182 : vector<2x64xf32>
    %184 = math.exp %183 : vector<2x64xf32>
    %cst_56 = arith.constant 1.000000e+00 : f32
    %185 = vector.broadcast %cst_56 : f32 to vector<2x64xf32>
    %186 = arith.addf %185, %184 : vector<2x64xf32>
    %187 = arith.divf %185, %186 : vector<2x64xf32>
    %188 = vector.extract_strided_slice %181 {offsets = [0, 64], sizes = [2, 32], strides = [1, 1]} : vector<2x128xf32> to vector<2x32xf32>
    %189 = math.tanh %188 : vector<2x32xf32>
    %190 = vector.extract_strided_slice %181 {offsets = [0, 96], sizes = [2, 32], strides = [1, 1]} : vector<2x128xf32> to vector<2x32xf32>
    %191 = arith.negf %190 : vector<2x32xf32>
    %192 = math.exp %191 : vector<2x32xf32>
    %cst_57 = arith.constant 1.000000e+00 : f32
    %193 = vector.broadcast %cst_57 : f32 to vector<2x32xf32>
    %194 = arith.addf %193, %192 : vector<2x32xf32>
    %195 = arith.divf %193, %194 : vector<2x32xf32>
    %196 = vector.extract_strided_slice %187 {offsets = [0, 32], sizes = [2, 32], strides = [1, 1]} : vector<2x64xf32> to vector<2x32xf32>
    %197 = arith.mulf %196, %166 : vector<2x32xf32>
    %198 = vector.extract_strided_slice %187 {offsets = [0, 0], sizes = [2, 32], strides = [1, 1]} : vector<2x64xf32> to vector<2x32xf32>
    %199 = arith.mulf %198, %189 : vector<2x32xf32>
    %200 = arith.addf %197, %199 : vector<2x32xf32>
    %201 = math.tanh %200 : vector<2x32xf32>
    %202 = arith.mulf %195, %201 : vector<2x32xf32>
    %c0_58 = arith.constant 0 : index
    %203 = arith.index_cast %176 : i32 to index
    %c0_59 = arith.constant 0 : index
    %c0_60 = arith.constant 0 : index
    %204 = vector.load %arg3[%c0_58, %203, %c0_59, %c0_60] : memref<1x8x2x32xf32, #tpu.memory_space<vmem>>, vector<1x1x2x32xf32>
    %205 = vector.shape_cast %204 : vector<1x1x2x32xf32> to vector<2x32xf32>
    %206 = vector.shape_cast %202 : vector<2x32xf32> to vector<1x1x2x32xf32>
    tpu.vector_store %arg3[%c0_58, %203, %c0_59, %c0_60], %206 {strides = array<i32>} : memref<1x8x2x32xf32, #tpu.memory_space<vmem>>, vector<1x1x2x32xf32>,
    %c6_i32 = arith.constant 6 : i32
    %c2_i32_61 = arith.constant 2 : i32
    %207 = arith.muli %c2_i32_61, %c6_i32 : i32
    %c7_i32_62 = arith.constant 7 : i32
    %208 = arith.subi %c7_i32_62, %207 : i32
    %209 = arith.muli %arg0, %208 : i32
    %210 = arith.addi %c6_i32, %209 : i32
    %211 = arith.index_cast %210 : i32 to index
    %c0_63 = arith.constant 0 : index
    %c0_64 = arith.constant 0 : index
    %212 = vector.load %arg1[%211, %c0_63, %c0_64] : memref<8x2x128xf32, #tpu.memory_space<vmem>>, vector<1x2x128xf32>
    %213 = vector.shape_cast %212 : vector<1x2x128xf32> to vector<2x128xf32>
    %cst_65 = arith.constant dense<0.000000e+00> : vector<2x128xf32>
    %214 = tpu.matmul %202, %1, %cst_65 {dimension_numbers = #tpu.dot_dimension_numbers<[1], [0], [0], [1], [0, 0, 1, 1], [], []>} : vector<2x32xf32>, vector<32x128xf32>, vector<2x128xf32> -> vector<2x128xf32>
    %215 = arith.addf %213, %214 : vector<2x128xf32>
    %216 = vector.extract_strided_slice %215 {offsets = [0, 0], sizes = [2, 64], strides = [1, 1]} : vector<2x128xf32> to vector<2x64xf32>
    %217 = arith.negf %216 : vector<2x64xf32>
    %218 = math.exp %217 : vector<2x64xf32>
    %cst_66 = arith.constant 1.000000e+00 : f32
    %219 = vector.broadcast %cst_66 : f32 to vector<2x64xf32>
    %220 = arith.addf %219, %218 : vector<2x64xf32>
    %221 = arith.divf %219, %220 : vector<2x64xf32>
    %222 = vector.extract_strided_slice %215 {offsets = [0, 64], sizes = [2, 32], strides = [1, 1]} : vector<2x128xf32> to vector<2x32xf32>
    %223 = math.tanh %222 : vector<2x32xf32>
    %224 = vector.extract_strided_slice %215 {offsets = [0, 96], sizes = [2, 32], strides = [1, 1]} : vector<2x128xf32> to vector<2x32xf32>
    %225 = arith.negf %224 : vector<2x32xf32>
    %226 = math.exp %225 : vector<2x32xf32>
    %cst_67 = arith.constant 1.000000e+00 : f32
    %227 = vector.broadcast %cst_67 : f32 to vector<2x32xf32>
    %228 = arith.addf %227, %226 : vector<2x32xf32>
    %229 = arith.divf %227, %228 : vector<2x32xf32>
    %230 = vector.extract_strided_slice %221 {offsets = [0, 32], sizes = [2, 32], strides = [1, 1]} : vector<2x64xf32> to vector<2x32xf32>
    %231 = arith.mulf %230, %200 : vector<2x32xf32>
    %232 = vector.extract_strided_slice %221 {offsets = [0, 0], sizes = [2, 32], strides = [1, 1]} : vector<2x64xf32> to vector<2x32xf32>
    %233 = arith.mulf %232, %223 : vector<2x32xf32>
    %234 = arith.addf %231, %233 : vector<2x32xf32>
    %235 = math.tanh %234 : vector<2x32xf32>
    %236 = arith.mulf %229, %235 : vector<2x32xf32>
    %c0_68 = arith.constant 0 : index
    %237 = arith.index_cast %210 : i32 to index
    %c0_69 = arith.constant 0 : index
    %c0_70 = arith.constant 0 : index
    %238 = vector.load %arg3[%c0_68, %237, %c0_69, %c0_70] : memref<1x8x2x32xf32, #tpu.memory_space<vmem>>, vector<1x1x2x32xf32>
    %239 = vector.shape_cast %238 : vector<1x1x2x32xf32> to vector<2x32xf32>
    %240 = vector.shape_cast %236 : vector<2x32xf32> to vector<1x1x2x32xf32>
    tpu.vector_store %arg3[%c0_68, %237, %c0_69, %c0_70], %240 {strides = array<i32>} : memref<1x8x2x32xf32, #tpu.memory_space<vmem>>, vector<1x1x2x32xf32>,
    %c7_i32_71 = arith.constant 7 : i32
    %c2_i32_72 = arith.constant 2 : i32
    %241 = arith.muli %c2_i32_72, %c7_i32_71 : i32
    %c7_i32_73 = arith.constant 7 : i32
    %242 = arith.subi %c7_i32_73, %241 : i32
    %243 = arith.muli %arg0, %242 : i32
    %244 = arith.addi %c7_i32_71, %243 : i32
    %245 = arith.index_cast %244 : i32 to index
    %c0_74 = arith.constant 0 : index
    %c0_75 = arith.constant 0 : index
    %246 = vector.load %arg1[%245, %c0_74, %c0_75] : memref<8x2x128xf32, #tpu.memory_space<vmem>>, vector<1x2x128xf32>
    %247 = vector.shape_cast %246 : vector<1x2x128xf32> to vector<2x128xf32>
    %cst_76 = arith.constant dense<0.000000e+00> : vector<2x128xf32>
    %248 = tpu.matmul %236, %1, %cst_76 {dimension_numbers = #tpu.dot_dimension_numbers<[1], [0], [0], [1], [0, 0, 1, 1], [], []>} : vector<2x32xf32>, vector<32x128xf32>, vector<2x128xf32> -> vector<2x128xf32>
    %249 = arith.addf %247, %248 : vector<2x128xf32>
    %250 = vector.extract_strided_slice %249 {offsets = [0, 0], sizes = [2, 64], strides = [1, 1]} : vector<2x128xf32> to vector<2x64xf32>
    %251 = arith.negf %250 : vector<2x64xf32>
    %252 = math.exp %251 : vector<2x64xf32>
    %cst_77 = arith.constant 1.000000e+00 : f32
    %253 = vector.broadcast %cst_77 : f32 to vector<2x64xf32>
    %254 = arith.addf %253, %252 : vector<2x64xf32>
    %255 = arith.divf %253, %254 : vector<2x64xf32>
    %256 = vector.extract_strided_slice %249 {offsets = [0, 64], sizes = [2, 32], strides = [1, 1]} : vector<2x128xf32> to vector<2x32xf32>
    %257 = math.tanh %256 : vector<2x32xf32>
    %258 = vector.extract_strided_slice %249 {offsets = [0, 96], sizes = [2, 32], strides = [1, 1]} : vector<2x128xf32> to vector<2x32xf32>
    %259 = arith.negf %258 : vector<2x32xf32>
    %260 = math.exp %259 : vector<2x32xf32>
    %cst_78 = arith.constant 1.000000e+00 : f32
    %261 = vector.broadcast %cst_78 : f32 to vector<2x32xf32>
    %262 = arith.addf %261, %260 : vector<2x32xf32>
    %263 = arith.divf %261, %262 : vector<2x32xf32>
    %264 = vector.extract_strided_slice %255 {offsets = [0, 32], sizes = [2, 32], strides = [1, 1]} : vector<2x64xf32> to vector<2x32xf32>
    %265 = arith.mulf %264, %234 : vector<2x32xf32>
    %266 = vector.extract_strided_slice %255 {offsets = [0, 0], sizes = [2, 32], strides = [1, 1]} : vector<2x64xf32> to vector<2x32xf32>
    %267 = arith.mulf %266, %257 : vector<2x32xf32>
    %268 = arith.addf %265, %267 : vector<2x32xf32>
    %269 = math.tanh %268 : vector<2x32xf32>
    %270 = arith.mulf %263, %269 : vector<2x32xf32>
    %c0_79 = arith.constant 0 : index
    %271 = arith.index_cast %244 : i32 to index
    %c0_80 = arith.constant 0 : index
    %c0_81 = arith.constant 0 : index
    %272 = vector.load %arg3[%c0_79, %271, %c0_80, %c0_81] : memref<1x8x2x32xf32, #tpu.memory_space<vmem>>, vector<1x1x2x32xf32>
    %273 = vector.shape_cast %272 : vector<1x1x2x32xf32> to vector<2x32xf32>
    %274 = vector.shape_cast %270 : vector<2x32xf32> to vector<1x1x2x32xf32>
    tpu.vector_store %arg3[%c0_79, %271, %c0_80, %c0_81], %274 {strides = array<i32>} : memref<1x8x2x32xf32, #tpu.memory_space<vmem>>, vector<1x1x2x32xf32>,
    %c8_i32 = arith.constant 8 : i32
    return
  }
  func.func @transform_0(%arg0: i32) -> (i32, i32, i32) {
    %c0_i32 = arith.constant 0 : i32
    %c0_i32_0 = arith.constant 0 : i32
    %c0_i32_1 = arith.constant 0 : i32
    return %c0_i32, %c0_i32_0, %arg0 : i32, i32, i32
  }
  func.func @transform_1(%arg0: i32) -> (i32, i32, i32) {
    %c0_i32 = arith.constant 0 : i32
    %c0_i32_0 = arith.constant 0 : i32
    %c0_i32_1 = arith.constant 0 : i32
    return %arg0, %c0_i32, %c0_i32_0 : i32, i32, i32
  }
  func.func @transform_2(%arg0: i32) -> (i32, i32, i32, i32) {
    %c0_i32 = arith.constant 0 : i32
    %c0_i32_0 = arith.constant 0 : i32
    %c0_i32_1 = arith.constant 0 : i32
    %c0_i32_2 = arith.constant 0 : i32
    return %arg0, %c0_i32, %c0_i32_0, %c0_i32_1 : i32, i32, i32, i32
  }
}

module attributes {stable_mosaic.version = 11 : i64} {
  func.func @_linear_kernel(%arg0: i32, %arg1: memref<16x64xf32, #tpu.memory_space<vmem>>, %arg2: memref<64x256xf32, #tpu.memory_space<vmem>>, %arg3: memref<1x256xf32, #tpu.memory_space<vmem>>, %arg4: memref<16x256xf32, #tpu.memory_space<vmem>>) attributes {dimension_semantics = [#tpu.dimension_semantics<parallel>], iteration_bounds = array<i64: 1>, scalar_prefetch = 0 : i64, scratch_operands = 0 : i64, tpu.core_type = #tpu.core_type<tc>, window_params = [{transform_indices = @transform_0, window_bounds = array<i64: 16, 64>}, {pipeline_mode = #tpu.pipeline_mode<synchronous>, transform_indices = @transform_1, window_bounds = array<i64: 64, 256>}, {pipeline_mode = #tpu.pipeline_mode<synchronous>, transform_indices = @transform_2, window_bounds = array<i64: 1, 256>}, {transform_indices = @transform_3, window_bounds = array<i64: 16, 256>}]} {
    %c0 = arith.constant 0 : index
    %c0_0 = arith.constant 0 : index
    %0 = vector.load %arg1[%c0, %c0_0] : memref<16x64xf32, #tpu.memory_space<vmem>>, vector<16x64xf32>
    %c0_1 = arith.constant 0 : index
    %c0_2 = arith.constant 0 : index
    %1 = vector.load %arg2[%c0_1, %c0_2] : memref<64x256xf32, #tpu.memory_space<vmem>>, vector<64x256xf32>
    %cst = arith.constant dense<0.000000e+00> : vector<16x256xf32>
    %2 = tpu.matmul %0, %1, %cst {dimension_numbers = #tpu.dot_dimension_numbers<[1], [0], [0], [1], [0, 0, 1, 1], [], []>} : vector<16x64xf32>, vector<64x256xf32>, vector<16x256xf32> -> vector<16x256xf32>
    %c0_3 = arith.constant 0 : index
    %c0_4 = arith.constant 0 : index
    %3 = vector.load %arg3[%c0_3, %c0_4] : memref<1x256xf32, #tpu.memory_space<vmem>>, vector<1x256xf32>
    %4 = vector.broadcast %3 : vector<1x256xf32> to vector<16x256xf32>
    %5 = arith.addf %2, %4 : vector<16x256xf32>
    %c0_5 = arith.constant 0 : index
    %c0_6 = arith.constant 0 : index
    %6 = vector.load %arg4[%c0_5, %c0_6] : memref<16x256xf32, #tpu.memory_space<vmem>>, vector<16x256xf32>
    tpu.vector_store %arg4[%c0_5, %c0_6], %5 {strides = array<i32>} : memref<16x256xf32, #tpu.memory_space<vmem>>, vector<16x256xf32>,
    return
  }
  func.func @transform_0(%arg0: i32) -> (i32, i32) {
    %c0_i32 = arith.constant 0 : i32
    %c0_i32_0 = arith.constant 0 : i32
    return %arg0, %c0_i32 : i32, i32
  }
  func.func @transform_1(%arg0: i32) -> (i32, i32) {
    %c0_i32 = arith.constant 0 : i32
    %c0_i32_0 = arith.constant 0 : i32
    %c0_i32_1 = arith.constant 0 : i32
    return %c0_i32, %c0_i32_0 : i32, i32
  }
  func.func @transform_2(%arg0: i32) -> (i32, i32) {
    %c0_i32 = arith.constant 0 : i32
    %c0_i32_0 = arith.constant 0 : i32
    %c0_i32_1 = arith.constant 0 : i32
    return %c0_i32, %c0_i32_0 : i32, i32
  }
  func.func @transform_3(%arg0: i32) -> (i32, i32) {
    %c0_i32 = arith.constant 0 : i32
    %c0_i32_0 = arith.constant 0 : i32
    return %arg0, %c0_i32 : i32, i32
  }
}

module attributes {stable_mosaic.version = 11 : i64} {
  func.func @_linear_kernel(%arg0: i32, %arg1: memref<16x128xf32, #tpu.memory_space<vmem>>, %arg2: memref<128x8xf32, #tpu.memory_space<vmem>>, %arg3: memref<1x8xf32, #tpu.memory_space<vmem>>, %arg4: memref<16x8xf32, #tpu.memory_space<vmem>>) attributes {dimension_semantics = [#tpu.dimension_semantics<parallel>], iteration_bounds = array<i64: 1>, scalar_prefetch = 0 : i64, scratch_operands = 0 : i64, tpu.core_type = #tpu.core_type<tc>, window_params = [{transform_indices = @transform_0, window_bounds = array<i64: 16, 128>}, {pipeline_mode = #tpu.pipeline_mode<synchronous>, transform_indices = @transform_1, window_bounds = array<i64: 128, 8>}, {pipeline_mode = #tpu.pipeline_mode<synchronous>, transform_indices = @transform_2, window_bounds = array<i64: 1, 8>}, {transform_indices = @transform_3, window_bounds = array<i64: 16, 8>}]} {
    %c0 = arith.constant 0 : index
    %c0_0 = arith.constant 0 : index
    %0 = vector.load %arg1[%c0, %c0_0] : memref<16x128xf32, #tpu.memory_space<vmem>>, vector<16x128xf32>
    %c0_1 = arith.constant 0 : index
    %c0_2 = arith.constant 0 : index
    %1 = vector.load %arg2[%c0_1, %c0_2] : memref<128x8xf32, #tpu.memory_space<vmem>>, vector<128x8xf32>
    %cst = arith.constant dense<0.000000e+00> : vector<16x8xf32>
    %2 = tpu.matmul %0, %1, %cst {dimension_numbers = #tpu.dot_dimension_numbers<[1], [0], [0], [1], [0, 0, 1, 1], [], []>} : vector<16x128xf32>, vector<128x8xf32>, vector<16x8xf32> -> vector<16x8xf32>
    %c0_3 = arith.constant 0 : index
    %c0_4 = arith.constant 0 : index
    %3 = vector.load %arg3[%c0_3, %c0_4] : memref<1x8xf32, #tpu.memory_space<vmem>>, vector<1x8xf32>
    %4 = vector.broadcast %3 : vector<1x8xf32> to vector<16x8xf32>
    %5 = arith.addf %2, %4 : vector<16x8xf32>
    %c0_5 = arith.constant 0 : index
    %c0_6 = arith.constant 0 : index
    %6 = vector.load %arg4[%c0_5, %c0_6] : memref<16x8xf32, #tpu.memory_space<vmem>>, vector<16x8xf32>
    tpu.vector_store %arg4[%c0_5, %c0_6], %5 {strides = array<i32>} : memref<16x8xf32, #tpu.memory_space<vmem>>, vector<16x8xf32>,
    return
  }
  func.func @transform_0(%arg0: i32) -> (i32, i32) {
    %c0_i32 = arith.constant 0 : i32
    %c0_i32_0 = arith.constant 0 : i32
    return %arg0, %c0_i32 : i32, i32
  }
  func.func @transform_1(%arg0: i32) -> (i32, i32) {
    %c0_i32 = arith.constant 0 : i32
    %c0_i32_0 = arith.constant 0 : i32
    %c0_i32_1 = arith.constant 0 : i32
    return %c0_i32, %c0_i32_0 : i32, i32
  }
  func.func @transform_2(%arg0: i32) -> (i32, i32) {
    %c0_i32 = arith.constant 0 : i32
    %c0_i32_0 = arith.constant 0 : i32
    %c0_i32_1 = arith.constant 0 : i32
    return %c0_i32, %c0_i32_0 : i32, i32
  }
  func.func @transform_3(%arg0: i32) -> (i32, i32) {
    %c0_i32 = arith.constant 0 : i32
    %c0_i32_0 = arith.constant 0 : i32
    return %arg0, %c0_i32 : i32, i32
  }
}

</mosaic_0001>

<bundles_post_ra>
// kernel: _lambda_.5
= control target key start
LH: loop header
LB: loop body
LE: loop exit
PB: predicated region body
PF: predicated region fallthrough
CT: control target
= control target key end

     0   :  { %v135_v3 = vmov 0.0   ;;  %vm34_vm0 = vcmask 195584   ;;  %v24_v9 = vlaneseq  ;;  %s195_s1 = inlined_call_operand.vmem [shape: f32[24,256], index: 1, kind: input, shape index: {}]   ;;  %s196_s0 = inlined_call_operand.vmem [shape: f32[16,24], index: 0, kind: input, shape index: {}]   ;;  %s197_s2 = inlined_call_operand.vmem [shape: f32[1,256], index: 2, kind: input, shape index: {}]   ;;  %s198_s3 = inlined_call_operand.vmem [shape: f32[16,256], index: 3, kind: output, shape index: {}]  }
   0x1   :  { %v21_v0 = vld [vmem:[%s195_s1 + $0x28] sm:$0xff]  ;;  %v20_v1 = vld [vmem:[%s195_s1 + $0x20] sm:$0xff]  ;;  %v19_v2 = vld [vmem:[%s195_s1 + $0x18] sm:$0xff]  ;;  %105 = vmatprep.mubr.f32.mxu0 %v135_v3  ;;  %111 = vmatprep.mubr.f32.mxu1 %v135_v3 }
   0x2   :  { %67 = vmatprep.subr.mxu0 %v21_v0  ;;  %128 = vmatprep.subr.mxu1 %v21_v0  ;;  %v18_v4 = vld [vmem:[%s195_s1 + $0x10] sm:$0xff]  ;;  %v17_v5 = vld [vmem:[%s195_s1 + $0x8] sm:$0xff]  ;;  %v16_v6 = vld [vmem:[%s195_s1] sm:$0xff]  ;;  %v25_v10 = vshrl.u32 %v24_v9, 7 }
   0x3   :  { %68 = vmatpush1.msra.mxu0 %v20_v1  ;;  %131 = vmatpush1.msra.mxu1 %v20_v1  ;;  %v14_v7 = vld [vmem:[%s196_s0] sm:$0xff]  ;;  %v15_v8 = vld [vmem:[%s196_s0 + $0x8] sm:$0xff] }
   0x4   :  { %69 = vmatprep.subr.mxu0 %v19_v2  ;;  %129 = vmatprep.subr.mxu1 %v19_v2  ;;  %v26_v11 = vsub.s32 0, %v25_v10  ;;  %v22_v12 = vld [vmem:[%s197_s2] sm:$0x3]  ;;  %v30_v13 = vsub.s32 1, %v25_v10 }
   0x5   :  { %70 = vmatpush1.msra.mxu0 %v18_v4  ;;  %132 = vmatpush1.msra.mxu1 %v18_v4 }
   0x6   :  { %71 = vmatprep.subr.mxu0 %v17_v5  ;;  %130 = vmatprep.subr.mxu1 %v17_v5  ;;  %v27_v14 = vrot.slane %v22_v12, %v26_v11  ;;  %v31_v15 = vrot.slane %v22_v12, %v30_v13 }
   0x7   :  { %72 = vmatpush1.msra.mxu0 %v16_v6  ;;  %133 = vmatpush1.msra.mxu1 %v16_v6 }
   0x8   :  { %126 = vmatmul.mubr.msk.f32.vlgmr.msra.gmra.mxu0 %vm34_vm0, %v14_v7  ;;  %127 = vmatmul.mubr.msk.f32.vlgmr.msra.gmra.mxu1 %vm34_vm0, %v15_v8 }
  0xc8   :  { %v107_v16 = vpop.f32.mrf.mxu0  ;;  %v113_v17 = vpop.f32.mrf.mxu1 }
  0xc9   :  { %v108_v18 = vadd.f32 %v107_v16, %v27_v14  ;;  %v114_v19 = vadd.f32 %v113_v17, %v27_v14 }
  0xca   :  { %v109_v20 = vpop.f32.mrf.mxu0  ;;  %v115_v21 = vpop.f32.mrf.mxu1 }
  0xcb   :  { %118 = vst [vmem:[%s198_s3] sm:$0xff] %v108_v18  ;;  %120 = vst [vmem:[%s198_s3 + $0x10] sm:$0xff] %v114_v19  ;;  %v110_v22 = vadd.f32 %v109_v20, %v31_v15  ;;  %v116_v23 = vadd.f32 %v115_v21, %v31_v15 }
  0xcd   :  { %119 = vst [vmem:[%s198_s3 + $0x8] sm:$0xff] %v110_v22  ;;  %121 = vst [vmem:[%s198_s3 + $0x18] sm:$0xff] %v116_v23 }

// kernel: _lambda_.7
= control target key start
LH: loop header
LB: loop body
LE: loop exit
PB: predicated region body
PF: predicated region fallthrough
CT: control target
= control target key end

     0   :  { %v155_v3 = vmov 0.0   ;;  %vm44_vm0 = vcmask 523264   ;;  %v34_v19 = vlaneseq  ;;  %s245_s1 = inlined_call_operand.vmem [shape: f32[64,256], index: 1, kind: input, shape index: {}]   ;;  %s246_s0 = inlined_call_operand.vmem [shape: f32[16,64], index: 0, kind: input, shape index: {}]   ;;  %s247_s2 = inlined_call_operand.vmem [shape: f32[1,256], index: 2, kind: input, shape index: {}]   ;;  %s248_s3 = inlined_call_operand.vmem [shape: f32[16,256], index: 3, kind: output, shape index: {}]  }
   0x1   :  { %v31_v0 = vld [vmem:[%s245_s1 + $0x78] sm:$0xff]  ;;  %v30_v1 = vld [vmem:[%s245_s1 + $0x70] sm:$0xff]  ;;  %v29_v2 = vld [vmem:[%s245_s1 + $0x68] sm:$0xff]  ;;  %115 = vmatprep.mubr.f32.mxu0 %v155_v3  ;;  %121 = vmatprep.mubr.f32.mxu1 %v155_v3 }
   0x2   :  { %67 = vmatprep.subr.mxu0 %v31_v0  ;;  %138 = vmatprep.subr.mxu1 %v31_v0  ;;  %v28_v4 = vld [vmem:[%s245_s1 + $0x60] sm:$0xff]  ;;  %v27_v5 = vld [vmem:[%s245_s1 + $0x58] sm:$0xff]  ;;  %v26_v6 = vld [vmem:[%s245_s1 + $0x50] sm:$0xff]  ;;  %v35_v20 = vshrl.u32 %v34_v19, 7 }
   0x3   :  { %68 = vmatpush1.msra.mxu0 %v30_v1  ;;  %146 = vmatpush1.msra.mxu1 %v30_v1  ;;  %v25_v7 = vld [vmem:[%s245_s1 + $0x48] sm:$0xff]  ;;  %v24_v8 = vld [vmem:[%s245_s1 + $0x40] sm:$0xff]  ;;  %v23_v9 = vld [vmem:[%s245_s1 + $0x38] sm:$0xff] }
   0x4   :  { %69 = vmatprep.subr.mxu0 %v29_v2  ;;  %139 = vmatprep.subr.mxu1 %v29_v2  ;;  %v22_v10 = vld [vmem:[%s245_s1 + $0x30] sm:$0xff]  ;;  %v21_v11 = vld [vmem:[%s245_s1 + $0x28] sm:$0xff]  ;;  %v20_v12 = vld [vmem:[%s245_s1 + $0x20] sm:$0xff]  ;;  %v36_v21 = vsub.s32 0, %v35_v20  ;;  %v40_v23 = vsub.s32 1, %v35_v20 }
   0x5   :  { %70 = vmatpush1.msra.mxu0 %v28_v4  ;;  %147 = vmatpush1.msra.mxu1 %v28_v4  ;;  %v19_v13 = vld [vmem:[%s245_s1 + $0x18] sm:$0xff]  ;;  %v18_v14 = vld [vmem:[%s245_s1 + $0x10] sm:$0xff]  ;;  %v17_v15 = vld [vmem:[%s245_s1 + $0x8] sm:$0xff] }
   0x6   :  { %71 = vmatprep.subr.mxu0 %v27_v5  ;;  %140 = vmatprep.subr.mxu1 %v27_v5  ;;  %v16_v16 = vld [vmem:[%s245_s1] sm:$0xff]  ;;  %v15_v18 = vld [vmem:[%s246_s0 + $0x8] sm:$0xff] }
   0x7   :  { %72 = vmatpush1.msra.mxu0 %v26_v6  ;;  %148 = vmatpush1.msra.mxu1 %v26_v6  ;;  %v14_v17 = vld [vmem:[%s246_s0] sm:$0xff] }
   0x8   :  { %73 = vmatprep.subr.mxu0 %v25_v7  ;;  %141 = vmatprep.subr.mxu1 %v25_v7  ;;  %v32_v22 = vld [vmem:[%s247_s2] sm:$0x3] }
   0x9   :  { %74 = vmatpush1.msra.mxu0 %v24_v8  ;;  %149 = vmatpush1.msra.mxu1 %v24_v8  ;;  %v37_v24 = vrot.slane %v32_v22, %v36_v21  ;;  %v41_v25 = vrot.slane %v32_v22, %v40_v23 }
   0xa   :  { %75 = vmatprep.subr.mxu0 %v23_v9  ;;  %142 = vmatprep.subr.mxu1 %v23_v9 }
   0xb   :  { %76 = vmatpush1.msra.mxu0 %v22_v10  ;;  %150 = vmatpush1.msra.mxu1 %v22_v10 }
   0xc   :  { %77 = vmatprep.subr.mxu0 %v21_v11  ;;  %143 = vmatprep.subr.mxu1 %v21_v11 }
   0xd   :  { %78 = vmatpush1.msra.mxu0 %v20_v12  ;;  %151 = vmatpush1.msra.mxu1 %v20_v12 }
   0xe   :  { %79 = vmatprep.subr.mxu0 %v19_v13  ;;  %144 = vmatprep.subr.mxu1 %v19_v13 }
   0xf   :  { %80 = vmatpush1.msra.mxu0 %v18_v14  ;;  %152 = vmatpush1.msra.mxu1 %v18_v14 }
  0x10   :  { %81 = vmatprep.subr.mxu0 %v17_v15  ;;  %145 = vmatprep.subr.mxu1 %v17_v15 }
  0x11   :  { %82 = vmatpush1.msra.mxu0 %v16_v16  ;;  %153 = vmatpush1.msra.mxu1 %v16_v16 }
  0x12   :  { %136 = vmatmul.mubr.msk.f32.vlgmr.msra.gmra.mxu0 %vm44_vm0, %v14_v17  ;;  %137 = vmatmul.mubr.msk.f32.vlgmr.msra.gmra.mxu1 %vm44_vm0, %v15_v18 }
  0xd2   :  { %v117_v26 = vpop.f32.mrf.mxu0  ;;  %v123_v27 = vpop.f32.mrf.mxu1 }
  0xd3   :  { %v118_v28 = vadd.f32 %v117_v26, %v37_v24  ;;  %v124_v29 = vadd.f32 %v123_v27, %v37_v24 }
  0xd4   :  { %v119_v30 = vpop.f32.mrf.mxu0  ;;  %v125_v31 = vpop.f32.mrf.mxu1 }
  0xd5   :  { %128 = vst [vmem:[%s248_s3] sm:$0xff] %v118_v28  ;;  %130 = vst [vmem:[%s248_s3 + $0x10] sm:$0xff] %v124_v29  ;;  %v120_v32 = vadd.f32 %v119_v30, %v41_v25  ;;  %v126_v33 = vadd.f32 %v125_v31, %v41_v25 }
  0xd7   :  { %129 = vst [vmem:[%s248_s3 + $0x8] sm:$0xff] %v120_v32  ;;  %131 = vst [vmem:[%s248_s3 + $0x18] sm:$0xff] %v126_v33 }

// kernel: _lambda_.6
= control target key start
LH: loop header
LB: loop body
LE: loop exit
PB: predicated region body
PF: predicated region fallthrough
CT: control target
= control target key end

     0   :  { %s1550_s9 = smov 0   ;;  %s1552_s10 = smov 0   ;;  %s1783_s0 = inlined_call_operand.vmem [shape: f32[8,2,256], index: 0, kind: input, shape index: {}]   ;;  %s1784_s1 = inlined_call_operand.vmem [shape: f32[2,32,128], index: 1, kind: input, shape index: {}]   ;;  %s1785_s2 = inlined_call_operand.vmem [shape: f32[2,8,2,32], index: 2, kind: output, shape index: {}]  }
   0x1   :  { %s1554_s11 = smov 0  }
   0x2 LB: > { %s1566_s12 = sadd.s32 4294967295, %s1529_s11   ;;  %s1569_s13 = sadd.s32 1, %s1529_s11   ;;  %s1529_s11 = sphi %s1554_s11, %s1788_s11   ;;  %s1525_s10 = sphi %s1552_s10, %s1787_s10   ;;  %s1521_s9 = sphi %s1550_s9, %s1786_s9  }
   0x3   : > { %s16_s14 = ssub.s32 %s1529_s11, %s1569_s13  ;;  %s19_s15 = sadd.s32 1, %s1525_s10 }
   0x4   : > { %p17_p0 = scmp.eq.s32.totalorder %s16_s14, 0  ;;  %p26_p1 = scmp.ne.s32.totalorder %s1525_s10, %s1521_s9 }
   0x5   : > { %p27_p2 = scmp.eq.s32.totalorder %s1529_s11, 0  ;;  %p1233_p4 = scmp.ge.s32.totalorder %s1529_s11, 2 }
   0x6   : > { %s1578_s16 = scalar_select %p17_p0, %s1525_s10, %s19_s15  }
   0x7   : > { %p28_p3 = por %p27_p2, %p26_p1  ;;  %104 = sbr.rel (%p1233_p4) target bundleno = 21 (0x15), region = 16 }
   0xc   : > { %107 = sbr.rel (!%p28_p3) target bundleno = 21 (0x15), region = 20  ;;  %s109_s17 = sand.u32 (%p28_p3), 1, %s1525_s10  }
   0xd   : > { %s1235_s18 = sshll.u32 (%p28_p3), %s1529_s11, 1  ;;  %s1234_s19 = sshll.u32 (%p28_p3), %s109_s17, 4 }
   0xe   : > { %s113_s22 = scalar_lea.vmem (%p28_p3), %s1783_s0, %s1235_s18  ;;  %s111_s23 = scalar_lea.vmem (%p28_p3), [#allocation2], %s1234_s19 }
   0xf   : > { %v130_v0 = vld [vmem:[%s113_s22] sm:$0x3] (%p28_p3)  ;;  %v132_v1 = vld [vmem:[%s113_s22 + $0x4] sm:$0x3] (%p28_p3)  ;;  %v134_v2 = vld [vmem:[%s113_s22 + $0x8] sm:$0x3] (%p28_p3) }
  0x10   : > { %131 = vst [vmem:[%s111_s23] sm:$0x3] (%p28_p3), %v130_v0  ;;  %133 = vst [vmem:[%s111_s23 + $0x2] sm:$0x3] (%p28_p3), %v132_v1  ;;  %v136_v3 = vld [vmem:[%s113_s22 + $0xc] sm:$0x3] (%p28_p3) }
  0x11   : > { %v138_v4 = vld [vmem:[%s113_s22 + $0x10] sm:$0x3]  ;;  %135 = vst [vmem:[%s111_s23 + $0x4] sm:$0x3] %v134_v2  ;;  %137 = vst [vmem:[%s111_s23 + $0x6] sm:$0x3] %v136_v3 }
  0x12   : > { %139 = vst [vmem:[%s111_s23 + $0x8] sm:$0x3] %v138_v4  ;;  %v140_v5 = vld [vmem:[%s113_s22 + $0x14] sm:$0x3]  ;;  %v142_v6 = vld [vmem:[%s113_s22 + $0x18] sm:$0x3] }
  0x13   : > { %v144_v7 = vld [vmem:[%s113_s22 + $0x1c] sm:$0x3]  ;;  %141 = vst [vmem:[%s111_s23 + $0xa] sm:$0x3] %v140_v5  ;;  %143 = vst [vmem:[%s111_s23 + $0xc] sm:$0x3] %v142_v6 }
  0x14   : > { %145 = vst [vmem:[%s111_s23 + $0xe] sm:$0x3] %v144_v7 }
  0x15 PF: > { %p1236_p5 = scmp.ge.s32.totalorder %s1529_s11, 1  ;;  %p192_p6 = scmp.lt.s32.totalorder %s1529_s11, 3 }
  0x17   : > { %p193_p7 = pnand %p1236_p5, %p192_p6 }
  0x18   : > { %p225_p8 = scmp.lt.s32.totalorder (!%p193_p7), %s1566_s12, 1  ;;  %s199_s29 = sand.u32 (!%p193_p7), 1, %s1521_s9  }
  0x19   : > { %196 = sbr.rel (%p193_p7) target bundleno = 5555 (0x15b3), region = 65  ;;  %s1237_s30 = sshll.u32 (!%p193_p7), %s199_s29, 4 }
  0x1a   : > { %s1242_s3 = smul.u32 (!%p193_p7), 14, %s1566_s12  ;;  %s1639_s4 = scalar_lea.vmem (!%p193_p7), [#allocation2], %s1237_s30 }
  0x1b   : > { %s1533_s6 = smov (!%p193_p7), 64   ;;  %s1534_s7 = smov (!%p193_p7), 32  }
  0x1c   : > { %s241_s5 = scalar_lea.vmem (!%p193_p7), %s1639_s4, %s1242_s3 [#allocation2]  ;;  %s1244_s17 = smul.u32 (!%p193_p7), 10, %s1566_s12 }
  0x1d   : > { %s1250_s20 = smul.u32 (!%p193_p7), 6, %s1566_s12  ;;  %s1256_s23 = sshll.u32 (!%p193_p7), %s1566_s12, 1 }
  0x1e   : > { %v1531_v8 = vmov 0.0   ;;  %vm1532_vm0 = vmmov 0   ;;  %s1593_s24 = scalar_select %p225_p8, %s1566_s12, 1  ;;  %v242_v13 = vld [vmem:[%s241_s5] sm:$0x3]  ;;  %vm347_vm1 = vcmask 254976  }
  0x1f   : > { %1327 = vmatprep.subr.mxu0 %v1531_v8  ;;  %1335 = vmatprep.mubr.msk.f32.mxu0 %vm1532_vm0, %v1531_v8  ;;  %vm243_vm2 = vcmask 261120   ;;  %s1148_s18 = scalar_lea.vmem %s1639_s4, %s1244_s17 [#allocation2]  ;;  %s1156_s21 = scalar_lea.vmem %s1639_s4, %s1250_s20 [#allocation2] }
  0x20   : > { %1338 = vmatprep.subr.mxu1 %v1531_v8  ;;  %1346 = vmatprep.mubr.msk.f32.mxu1 %vm1532_vm0, %v1531_v8  ;;  %s1285_s25 = sshll.u32 %s1593_s24, 5  ;;  %s1286_s8 = sshll.u32 %s1593_s24, 4  ;;  %v1245_v31 = vld [vmem:[%s1148_s18 + $0x2] sm:$0x3]  ;;  %v1251_v49 = vld [vmem:[%s1156_s21 + $0x4] sm:$0x3] }
  0x21   : > { %s229_s28 = scalar_lea.vmem %s1784_s1, %s1285_s25  ;;  %s1652_s14 = scalar_lea.vmem %s1785_s2, %s1286_s8 }
  0x22   : > { %v1602_v9 = vld [vmem:[%s229_s28 + $0x18] sm:$0xff]  ;;  %v1604_v10 = vld [vmem:[%s229_s28 + $0x10] sm:$0xff]  ;;  %v1609_v11 = vld [vmem:[%s229_s28 + $0x8] sm:$0xff]  ;;  %s346_s15 = scalar_lea.vmem %s1652_s14, %s1242_s3  ;;  %s1152_s19 = scalar_lea.vmem %s1652_s14, %s1244_s17 }
  0x23   : > { %1328 = vmatpush3.msra.mxu0 %v1602_v9  ;;  %1339 = vmatpush3.msra.mxu1 %v1602_v9  ;;  %v1615_v12 = vld [vmem:[%s229_s28] sm:$0xff]  ;;  %s1160_s22 = scalar_lea.vmem %s1652_s14, %s1250_s20  ;;  %s1163_s24 = scalar_lea.vmem %s1639_s4, %s1256_s23 [#allocation2] }
  0x24   : > { %1329 = vmatprep.subr.mxu0 %v1531_v8  ;;  %1340 = vmatprep.subr.mxu1 %v1531_v8  ;;  %v1257_v3 = vld [vmem:[%s1163_s24 + $0x6] sm:$0x3]  ;;  %s1166_s25 = scalar_lea.vmem %s1652_s14, %s1256_s23  ;;  %s672_s26 = ssub.s32 4, %s1566_s12 }
  0x25   : > { %1330 = vmatpush3.msra.mxu0 %v1604_v10  ;;  %1341 = vmatpush3.msra.mxu1 %v1604_v10  ;;  %s1726_s27 = sshll.u32 %s672_s26, 1  ;;  %s1265_s30 = smul.u32 4294967290, %s1566_s12 }
  0x26   : > { %1331 = vmatprep.subr.mxu0 %v1531_v8  ;;  %1342 = vmatprep.subr.mxu1 %v1531_v8  ;;  %s674_s28 = scalar_lea.vmem %s1639_s4, %s1726_s27 [#allocation2]  ;;  %s777_s29 = scalar_lea.vmem %s1652_s14, %s1726_s27 }
  0x27   : > { %1332 = vmatpush3.msra.mxu0 %v1609_v11  ;;  %1343 = vmatpush3.msra.mxu1 %v1609_v11  ;;  %s1174_s3 = scalar_lea.vmem %s1639_s4, %s1265_s30 [#allocation2]  ;;  %s1178_s5 = scalar_lea.vmem %s1652_s14, %s1265_s30 }
  0x28   : > { %1333 = vmatprep.subr.mxu0 %v1531_v8  ;;  %1344 = vmatprep.subr.mxu1 %v1531_v8  ;;  %s1271_s8 = smul.u32 4294967286, %s1566_s12 }
  0x29   : > { %1334 = vmatpush3.msra.mxu0 %v1615_v12  ;;  %1345 = vmatpush3.msra.mxu1 %v1615_v12 }
  0x2a   : > { %1336 = vmatmul.mubr.f32.vlgmr.msra.gmra.mxu0 %v1531_v8  ;;  %1349 = vmatprep.subr.mxu0 %v1531_v8  ;;  %s1182_s9 = scalar_lea.vmem %s1639_s4, %s1271_s8 [#allocation2]  ;;  %s1186_s11 = scalar_lea.vmem %s1652_s14, %s1271_s8 }
  0x2b   : > { %1350 = vmatpush3.msra.mxu0 %v1602_v9  ;;  %1357 = vmatprep.mubr.msk.f32.mxu0 %vm1532_vm0, %v1531_v8 }
  0x2c   : > { %1351 = vmatprep.subr.mxu0 %v1531_v8  ;;  %1360 = vmatprep.subr.mxu1 %v1531_v8 }
  0x2d   : > { %1352 = vmatpush3.msra.mxu0 %v1604_v10 }
  0x2e   : > { %1353 = vmatprep.subr.mxu0 %v1531_v8 }
  0x2f   : > { %1354 = vmatpush3.msra.mxu0 %v1609_v11 }
  0x30   : > { %1355 = vmatprep.subr.mxu0 %v1531_v8 }
  0x31   : > { %1356 = vmatpush3.msra.mxu0 %v1615_v12 }
  0x32   : > { %1371 = vmatprep.subr.mxu0 %v1531_v8 }
  0xea   : > { %v313_v14 = vpop.f32.mrf.mxu0 }
  0xeb   : > { %v317_v15 = vadd.f32 %v313_v14, %v242_v13 }
  0xec   : > { %v1337_v16 = vpop.f32.mrf.mxu0 }
  0xed   : > { %1443 = vtanh.f32 %v317_v15  ;;  %v1243_v18 = vmul.f32 -1.442695, %v317_v15 }
  0xef   : > { %1445 = vpow2.f32 %v1243_v18 }
  0xfa   : > { %v1444_v17 = vpop.eup %1443 }
  0xfb   : > { %327 = vrot.lane.b32.xlu0 %v1444_v17, %s1533_s6 }
  0xfc   : > { %v1446_v19 = vpop.eup %1445 }
  0xfd   : > { %v321_v20 = vadd.f32 1.0, %v1446_v19 }
  0xff   : > { %1447 = vrcp.f32 %v321_v20 }
 0x10c   : > { %v1448_v21 = vpop.eup %1447 }
 0x10d   : > { %v325_v24 = vmul.f32 0.0, %v1448_v21 }
 0x16d   : > { %v328_v22 = vpop.permute.xlu0 %327 }
 0x16e   : > { %v330_v23 = vmul.f32 %v1448_v21, %v328_v22 }
 0x170   : > { %332 = vrot.lane.b32.xlu0 %v330_v23, %s1534_s7 }
 0x1e2   : > { %v333_v25 = vpop.permute.xlu0 %332 }
 0x1e3   : > { %v335_v26 = vadd.f32 %v333_v25, %v325_v24 }
 0x1e5   : > { %1449 = vtanh.f32 %v335_v26 }
 0x1f2   : > { %v1450_v27 = vpop.eup %1449 }
 0x1f3   : > { %338 = vrot.lane.b32.xlu1 %v1450_v27, %s1533_s6 }
 0x265   : > { %v339_v28 = vpop.permute.xlu1 %338 }
 0x266   : > { %v341_v29 = vmul.f32 %v1448_v21, %v339_v28 }
 0x268   : > { %343 = vrot.lane.b32.xlu1 %v341_v29, %s1534_s7 }
 0x2da   : > { %v344_v30 = vpop.permute.xlu1 %343 }
 0x2db   : > { %348 = vst.msk [vmem:[%s346_s15] sm:$0x3] %vm347_vm1, %v344_v30  ;;  %1347 = vmatmul.mubr.msk.f32.vlgmr.msra.gmra.mxu1 %vm243_vm2, %v344_v30  ;;  %s1277_s15 = smul.u32 4294967282, %s1566_s12 }
 0x2dc   : > { %1361 = vmatpush3.msra.mxu1 %v1602_v9  ;;  %1368 = vmatprep.mubr.msk.f32.mxu1 %vm1532_vm0, %v1531_v8 }
 0x2dd   : > { %1362 = vmatprep.subr.mxu1 %v1531_v8  ;;  %s1190_s17 = scalar_lea.vmem %s1639_s4, %s1277_s15 [#allocation2]  ;;  %s1194_s12 = scalar_lea.vmem %s1652_s14, %s1277_s15 }
 0x2de   : > { %1363 = vmatpush3.msra.mxu1 %v1604_v10 }
 0x2df   : > { %1364 = vmatprep.subr.mxu1 %v1531_v8 }
 0x2e0   : > { %1365 = vmatpush3.msra.mxu1 %v1609_v11 }
 0x2e1   : > { %1366 = vmatprep.subr.mxu1 %v1531_v8 }
 0x2e2   : > { %1367 = vmatpush3.msra.mxu1 %v1615_v12 }
 0x2e3   : > { %1382 = vmatprep.subr.mxu1 %v1531_v8 }
 0x39b   : > { %v422_v32 = vpop.f32.mrf.mxu1 }
 0x39c   : > { %v426_v33 = vadd.f32 %v1245_v31, %v422_v32 }
 0x39d   : > { %v1348_v34 = vpop.f32.mrf.mxu1 }
 0x39e   : > { %1451 = vtanh.f32 %v426_v33  ;;  %v1247_v36 = vmul.f32 -1.442695, %v426_v33 }
 0x3a0   : > { %1453 = vpow2.f32 %v1247_v36 }
 0x3ab   : > { %v1452_v35 = vpop.eup %1451 }
 0x3ac   : > { %436 = vrot.lane.b32.xlu0 %v1452_v35, %s1533_s6 }
 0x3ad   : > { %v1454_v37 = vpop.eup %1453 }
 0x3ae   : > { %v430_v38 = vadd.f32 1.0, %v1454_v37 }
 0x3b0   : > { %1455 = vrcp.f32 %v430_v38 }
 0x3bd   : > { %v1456_v39 = vpop.eup %1455 }
 0x3be   : > { %v434_v42 = vmul.f32 %v1456_v39, %v335_v26  ;;  %v675_v26 = vld [vmem:[%s674_s28] sm:$0x3] }
 0x41e   : > { %v437_v40 = vpop.permute.xlu0 %436 }
 0x41f   : > { %v439_v41 = vmul.f32 %v1456_v39, %v437_v40 }
 0x421   : > { %441 = vrot.lane.b32.xlu1 %v439_v41, %s1534_s7 }
 0x493   : > { %v442_v43 = vpop.permute.xlu1 %441 }
 0x494   : > { %v444_v44 = vadd.f32 %v442_v43, %v434_v42 }
 0x496   : > { %1457 = vtanh.f32 %v444_v44 }
 0x4a3   : > { %v1458_v45 = vpop.eup %1457 }
 0x4a4   : > { %447 = vrot.lane.b32.xlu0 %v1458_v45, %s1533_s6 }
 0x516   : > { %v448_v46 = vpop.permute.xlu0 %447 }
 0x517   : > { %v450_v47 = vmul.f32 %v1456_v39, %v448_v46 }
 0x519   : > { %452 = vrot.lane.b32.xlu1 %v450_v47, %s1534_s7 }
 0x58b   : > { %v453_v48 = vpop.permute.xlu1 %452 }
 0x58c   : > { %1249 = vst.msk [vmem:[%s1152_s19 + $0x2] sm:$0x3] %vm347_vm1, %v453_v48  ;;  %1358 = vmatmul.mubr.msk.f32.vlgmr.msra.gmra.mxu0 %vm243_vm2, %v453_v48 }
 0x58d   : > { %1372 = vmatpush3.msra.mxu0 %v1602_v9  ;;  %1379 = vmatprep.mubr.msk.f32.mxu0 %vm1532_vm0, %v1531_v8 }
 0x58e   : > { %1373 = vmatprep.subr.mxu0 %v1531_v8 }
 0x58f   : > { %1374 = vmatpush3.msra.mxu0 %v1604_v10 }
 0x590   : > { %1375 = vmatprep.subr.mxu0 %v1531_v8 }
 0x591   : > { %1376 = vmatpush3.msra.mxu0 %v1609_v11 }
 0x592   : > { %1377 = vmatprep.subr.mxu0 %v1531_v8 }
 0x593   : > { %1378 = vmatpush3.msra.mxu0 %v1615_v12 }
 0x594   : > { %1393 = vmatprep.subr.mxu0 %v1531_v8 }
 0x64c   : > { %v530_v50 = vpop.f32.mrf.mxu0 }
 0x64d   : > { %v534_v51 = vadd.f32 %v1251_v49, %v530_v50 }
 0x64e   : > { %v1359_v52 = vpop.f32.mrf.mxu0 }
 0x64f   : > { %1459 = vtanh.f32 %v534_v51  ;;  %v1253_v54 = vmul.f32 -1.442695, %v534_v51 }
 0x651   : > { %1461 = vpow2.f32 %v1253_v54 }
 0x65c   : > { %v1460_v53 = vpop.eup %1459 }
 0x65d   : > { %544 = vrot.lane.b32.xlu0 %v1460_v53, %s1533_s6 }
 0x65e   : > { %v1462_v55 = vpop.eup %1461 }
 0x65f   : > { %v538_v56 = vadd.f32 1.0, %v1462_v55 }
 0x661   : > { %1463 = vrcp.f32 %v538_v56 }
 0x66e   : > { %v1464_v57 = vpop.eup %1463 }
 0x66f   : > { %v542_v60 = vmul.f32 %v1464_v57, %v444_v44  ;;  %v1266_v44 = vld [vmem:[%s1174_s3 + $0xa] sm:$0x3] }
 0x6cf   : > { %v545_v58 = vpop.permute.xlu0 %544 }
 0x6d0   : > { %v547_v59 = vmul.f32 %v1464_v57, %v545_v58 }
 0x6d2   : > { %549 = vrot.lane.b32.xlu1 %v547_v59, %s1534_s7 }
 0x744   : > { %v550_v61 = vpop.permute.xlu1 %549 }
 0x745   : > { %v552_v62 = vadd.f32 %v550_v61, %v542_v60 }
 0x747   : > { %1465 = vtanh.f32 %v552_v62 }
 0x754   : > { %v1466_v63 = vpop.eup %1465 }
 0x755   : > { %555 = vrot.lane.b32.xlu0 %v1466_v63, %s1533_s6 }
 0x7c7   : > { %v556_v0 = vpop.permute.xlu0 %555 }
 0x7c8   : > { %v558_v1 = vmul.f32 %v1464_v57, %v556_v0  ;;  %v1272_v57 = vld [vmem:[%s1182_s9 + $0xc] sm:$0x3] }
 0x7ca   : > { %560 = vrot.lane.b32.xlu1 %v558_v1, %s1534_s7 }
 0x83c   : > { %v561_v2 = vpop.permute.xlu1 %560 }
 0x83d   : > { %1255 = vst.msk [vmem:[%s1160_s22 + $0x4] sm:$0x3] %vm347_vm1, %v561_v2  ;;  %1369 = vmatmul.mubr.msk.f32.vlgmr.msra.gmra.mxu1 %vm243_vm2, %v561_v2 }
 0x83e   : > { %1383 = vmatpush3.msra.mxu1 %v1602_v9  ;;  %1390 = vmatprep.mubr.msk.f32.mxu1 %vm1532_vm0, %v1531_v8 }
 0x83f   : > { %1384 = vmatprep.subr.mxu1 %v1531_v8 }
 0x840   : > { %1385 = vmatpush3.msra.mxu1 %v1604_v10 }
 0x841   : > { %1386 = vmatprep.subr.mxu1 %v1531_v8 }
 0x842   : > { %1387 = vmatpush3.msra.mxu1 %v1609_v11 }
 0x843   : > { %1388 = vmatprep.subr.mxu1 %v1531_v8 }
 0x844   : > { %1389 = vmatpush3.msra.mxu1 %v1615_v12 }
 0x845   : > { %1404 = vmatprep.subr.mxu1 %v1531_v8 }
 0x8fd   : > { %v637_v4 = vpop.f32.mrf.mxu1 }
 0x8fe   : > { %v641_v5 = vadd.f32 %v1257_v3, %v637_v4 }
 0x8ff   : > { %v1370_v6 = vpop.f32.mrf.mxu1 }
 0x900   : > { %1467 = vtanh.f32 %v641_v5  ;;  %v1259_v13 = vmul.f32 -1.442695, %v641_v5 }
 0x902   : > { %1469 = vpow2.f32 %v1259_v13 }
 0x90d   : > { %v1468_v7 = vpop.eup %1467 }
 0x90e   : > { %651 = vrot.lane.b32.xlu0 %v1468_v7, %s1533_s6 }
 0x90f   : > { %v1470_v14 = vpop.eup %1469 }
 0x910   : > { %v645_v15 = vadd.f32 1.0, %v1470_v14 }
 0x912   : > { %1471 = vrcp.f32 %v645_v15 }
 0x91f   : > { %v1472_v16 = vpop.eup %1471 }
 0x920   : > { %v649_v19 = vmul.f32 %v1472_v16, %v552_v62 }
 0x980   : > { %v652_v17 = vpop.permute.xlu0 %651 }
 0x981   : > { %v654_v18 = vmul.f32 %v1472_v16, %v652_v17 }
 0x983   : > { %656 = vrot.lane.b32.xlu1 %v654_v18, %s1534_s7 }
 0x9f5   : > { %v657_v20 = vpop.permute.xlu1 %656 }
 0x9f6   : > { %v659_v21 = vadd.f32 %v657_v20, %v649_v19 }
 0x9f8   : > { %1473 = vtanh.f32 %v659_v21 }
 0xa05   : > { %v1474_v22 = vpop.eup %1473 }
 0xa06   : > { %662 = vrot.lane.b32.xlu0 %v1474_v22, %s1533_s6 }
 0xa78   : > { %v663_v23 = vpop.permute.xlu0 %662 }
 0xa79   : > { %v665_v24 = vmul.f32 %v1472_v16, %v663_v23  ;;  %v1278_v16 = vld [vmem:[%s1190_s17 + $0xe] sm:$0x3] }
 0xa7b   : > { %667 = vrot.lane.b32.xlu1 %v665_v24, %s1534_s7 }
 0xaed   : > { %v668_v25 = vpop.permute.xlu1 %667 }
 0xaee   : > { %1261 = vst.msk [vmem:[%s1166_s25 + $0x6] sm:$0x3] %vm347_vm1, %v668_v25  ;;  %1380 = vmatmul.mubr.msk.f32.vlgmr.msra.gmra.mxu0 %vm243_vm2, %v668_v25 }
 0xaef   : > { %1394 = vmatpush3.msra.mxu0 %v1602_v9  ;;  %1401 = vmatprep.mubr.msk.f32.mxu0 %vm1532_vm0, %v1531_v8 }
 0xaf0   : > { %1395 = vmatprep.subr.mxu0 %v1531_v8 }
 0xaf1   : > { %1396 = vmatpush3.msra.mxu0 %v1604_v10 }
 0xaf2   : > { %1397 = vmatprep.subr.mxu0 %v1531_v8 }
 0xaf3   : > { %1398 = vmatpush3.msra.mxu0 %v1609_v11 }
 0xaf4   : > { %1399 = vmatprep.subr.mxu0 %v1531_v8 }
 0xaf5   : > { %1400 = vmatpush3.msra.mxu0 %v1615_v12 }
 0xbae   : > { %v744_v27 = vpop.f32.mrf.mxu0 }
 0xbaf   : > { %v748_v28 = vadd.f32 %v744_v27, %v675_v26 }
 0xbb0   : > { %v1381_v29 = vpop.f32.mrf.mxu0 }
 0xbb1   : > { %1475 = vtanh.f32 %v748_v28  ;;  %v1264_v31 = vmul.f32 -1.442695, %v748_v28 }
 0xbb3   : > { %1477 = vpow2.f32 %v1264_v31 }
 0xbbe   : > { %v1476_v30 = vpop.eup %1475 }
 0xbbf   : > { %758 = vrot.lane.b32.xlu0 %v1476_v30, %s1533_s6 }
 0xbc0   : > { %v1478_v32 = vpop.eup %1477 }
 0xbc1   : > { %v752_v33 = vadd.f32 1.0, %v1478_v32 }
 0xbc3   : > { %1479 = vrcp.f32 %v752_v33 }
 0xbd0   : > { %v1480_v34 = vpop.eup %1479 }
 0xbd1   : > { %v756_v37 = vmul.f32 %v1480_v34, %v659_v21 }
 0xc31   : > { %v759_v35 = vpop.permute.xlu0 %758 }
 0xc32   : > { %v761_v36 = vmul.f32 %v1480_v34, %v759_v35 }
 0xc34   : > { %763 = vrot.lane.b32.xlu1 %v761_v36, %s1534_s7 }
 0xca6   : > { %v764_v38 = vpop.permute.xlu1 %763 }
 0xca7   : > { %v766_v39 = vadd.f32 %v764_v38, %v756_v37 }
 0xca9   : > { %1481 = vtanh.f32 %v766_v39 }
 0xcb6   : > { %v1482_v40 = vpop.eup %1481 }
 0xcb7   : > { %769 = vrot.lane.b32.xlu0 %v1482_v40, %s1533_s6 }
 0xd29   : > { %v770_v41 = vpop.permute.xlu0 %769 }
 0xd2a   : > { %v772_v42 = vmul.f32 %v1480_v34, %v770_v41 }
 0xd2c   : > { %774 = vrot.lane.b32.xlu1 %v772_v42, %s1534_s7 }
 0xd9e   : > { %v775_v43 = vpop.permute.xlu1 %774 }
 0xd9f   : > { %778 = vst.msk [vmem:[%s777_s29] sm:$0x3] %vm347_vm1, %v775_v43  ;;  %1391 = vmatmul.mubr.msk.f32.vlgmr.msra.gmra.mxu1 %vm243_vm2, %v775_v43 }
 0xda0   : > { %1405 = vmatpush3.msra.mxu1 %v1602_v9  ;;  %1412 = vmatprep.mubr.msk.f32.mxu1 %vm1532_vm0, %v1531_v8 }
 0xda1   : > { %1406 = vmatprep.subr.mxu1 %v1531_v8 }
 0xda2   : > { %1407 = vmatpush3.msra.mxu1 %v1604_v10 }
 0xda3   : > { %1408 = vmatprep.subr.mxu1 %v1531_v8 }
 0xda4   : > { %1409 = vmatpush3.msra.mxu1 %v1609_v11 }
 0xda5   : > { %1410 = vmatprep.subr.mxu1 %v1531_v8 }
 0xda6   : > { %1411 = vmatpush3.msra.mxu1 %v1615_v12 }
 0xe5f   : > { %v852_v45 = vpop.f32.mrf.mxu1 }
 0xe60   : > { %v856_v9 = vadd.f32 %v1266_v44, %v852_v45 }
 0xe61   : > { %v1392_v46 = vpop.f32.mrf.mxu1 }
 0xe62   : > { %1483 = vtanh.f32 %v856_v9  ;;  %v1268_v48 = vmul.f32 -1.442695, %v856_v9 }
 0xe64   : > { %1485 = vpow2.f32 %v1268_v48 }
 0xe6f   : > { %v1484_v47 = vpop.eup %1483 }
 0xe70   : > { %866 = vrot.lane.b32.xlu0 %v1484_v47, %s1533_s6 }
 0xe71   : > { %v1486_v10 = vpop.eup %1485 }
 0xe72   : > { %v860_v49 = vadd.f32 1.0, %v1486_v10 }
 0xe74   : > { %1487 = vrcp.f32 %v860_v49 }
 0xe81   : > { %v1488_v11 = vpop.eup %1487 }
 0xe82   : > { %v864_v50 = vmul.f32 %v1488_v11, %v766_v39 }
 0xee2   : > { %v867_v8 = vpop.permute.xlu0 %866 }
 0xee3   : > { %v869_v12 = vmul.f32 %v1488_v11, %v867_v8 }
 0xee5   : > { %871 = vrot.lane.b32.xlu1 %v869_v12, %s1534_s7 }
 0xf57   : > { %v872_v51 = vpop.permute.xlu1 %871 }
 0xf58   : > { %v874_v52 = vadd.f32 %v872_v51, %v864_v50 }
 0xf5a   : > { %1489 = vtanh.f32 %v874_v52 }
 0xf67   : > { %v1490_v53 = vpop.eup %1489 }
 0xf68   : > { %877 = vrot.lane.b32.xlu0 %v1490_v53, %s1533_s6 }
 0xfda   : > { %v878_v54 = vpop.permute.xlu0 %877 }
 0xfdb   : > { %v880_v55 = vmul.f32 %v1488_v11, %v878_v54 }
 0xfdd   : > { %882 = vrot.lane.b32.xlu1 %v880_v55, %s1534_s7 }
0x104f   : > { %v883_v56 = vpop.permute.xlu1 %882 }
0x1050   : > { %1270 = vst.msk [vmem:[%s1178_s5 + $0xa] sm:$0x3] %vm347_vm1, %v883_v56  ;;  %1402 = vmatmul.mubr.msk.f32.vlgmr.msra.gmra.mxu0 %vm243_vm2, %v883_v56 }
0x1110   : > { %v960_v58 = vpop.f32.mrf.mxu0 }
0x1111   : > { %v964_v59 = vadd.f32 %v1272_v57, %v960_v58 }
0x1112   : > { %v1403_v60 = vpop.f32.mrf.mxu0 }
0x1113   : > { %1491 = vtanh.f32 %v964_v59  ;;  %v1274_v62 = vmul.f32 -1.442695, %v964_v59 }
0x1115   : > { %1493 = vpow2.f32 %v1274_v62 }
0x1120   : > { %v1492_v61 = vpop.eup %1491 }
0x1121   : > { %974 = vrot.lane.b32.xlu0 %v1492_v61, %s1533_s6 }
0x1122   : > { %v1494_v63 = vpop.eup %1493 }
0x1123   : > { %v968_v0 = vadd.f32 1.0, %v1494_v63 }
0x1125   : > { %1495 = vrcp.f32 %v968_v0 }
0x1132   : > { %v1496_v1 = vpop.eup %1495 }
0x1133   : > { %v972_v4 = vmul.f32 %v1496_v1, %v874_v52 }
0x1193   : > { %v975_v2 = vpop.permute.xlu0 %974 }
0x1194   : > { %v977_v3 = vmul.f32 %v1496_v1, %v975_v2 }
0x1196   : > { %979 = vrot.lane.b32.xlu1 %v977_v3, %s1534_s7 }
0x1208   : > { %v980_v5 = vpop.permute.xlu1 %979 }
0x1209   : > { %v982_v6 = vadd.f32 %v980_v5, %v972_v4 }
0x120b   : > { %1497 = vtanh.f32 %v982_v6 }
0x1218   : > { %v1498_v7 = vpop.eup %1497 }
0x1219   : > { %985 = vrot.lane.b32.xlu0 %v1498_v7, %s1533_s6 }
0x128b   : > { %v986_v13 = vpop.permute.xlu0 %985 }
0x128c   : > { %v988_v14 = vmul.f32 %v1496_v1, %v986_v13 }
0x128e   : > { %990 = vrot.lane.b32.xlu1 %v988_v14, %s1534_s7 }
0x1300   : > { %v991_v15 = vpop.permute.xlu1 %990 }
0x1301   : > { %1276 = vst.msk [vmem:[%s1186_s11 + $0xc] sm:$0x3] %vm347_vm1, %v991_v15  ;;  %1413 = vmatmul.mubr.msk.f32.vlgmr.msra.gmra.mxu1 %vm243_vm2, %v991_v15 }
0x13c1   : > { %v1068_v17 = vpop.f32.mrf.mxu1 }
0x13c2   : > { %v1072_v18 = vadd.f32 %v1278_v16, %v1068_v17 }
0x13c3   : > { %v1414_v19 = vpop.f32.mrf.mxu1 }
0x13c4   : > { %1499 = vtanh.f32 %v1072_v18  ;;  %v1280_v21 = vmul.f32 -1.442695, %v1072_v18 }
0x13c6   : > { %1501 = vpow2.f32 %v1280_v21 }
0x13d1   : > { %v1500_v20 = vpop.eup %1499 }
0x13d2   : > { %1082 = vrot.lane.b32.xlu0 %v1500_v20, %s1533_s6 }
0x13d3   : > { %v1502_v22 = vpop.eup %1501 }
0x13d4   : > { %v1076_v23 = vadd.f32 1.0, %v1502_v22 }
0x13d6   : > { %1503 = vrcp.f32 %v1076_v23 }
0x13e3   : > { %v1504_v24 = vpop.eup %1503 }
0x13e4   : > { %v1080_v27 = vmul.f32 %v1504_v24, %v982_v6 }
0x1444   : > { %v1083_v25 = vpop.permute.xlu0 %1082 }
0x1445   : > { %v1085_v26 = vmul.f32 %v1504_v24, %v1083_v25 }
0x1447   : > { %1087 = vrot.lane.b32.xlu1 %v1085_v26, %s1534_s7 }
0x14b9   : > { %v1088_v28 = vpop.permute.xlu1 %1087 }
0x14ba   : > { %v1090_v29 = vadd.f32 %v1088_v28, %v1080_v27 }
0x14bc   : > { %1505 = vtanh.f32 %v1090_v29 }
0x14c9   : > { %v1506_v30 = vpop.eup %1505 }
0x14ca   : > { %1093 = vrot.lane.b32.xlu0 %v1506_v30, %s1533_s6 }
0x153c   : > { %v1094_v31 = vpop.permute.xlu0 %1093 }
0x153d   : > { %v1096_v32 = vmul.f32 %v1504_v24, %v1094_v31 }
0x153f   : > { %1098 = vrot.lane.b32.xlu1 %v1096_v32, %s1534_s7 }
0x15b1   : > { %v1099_v33 = vpop.permute.xlu1 %1098 }
0x15b2   : > { %1282 = vst.msk [vmem:[%s1194_s12 + $0xe] sm:$0x3] %vm347_vm1, %v1099_v33 }
0x15b3 PF: > { %p9_p9 = scmp.ge.s32.totalorder %s1569_s13, 4   ;;  %s1786_s9 = smov %s1525_s10 }
0x15b4   : > { %s1787_s10 = smov %s1578_s16  ;;  %s1788_s11 = smov %s1569_s13 }
0x15b5   :  { %11 = sbr.rel (!%p9_p9) target bundleno = 2 (0x2), region = 123 }

// kernel: _lambda_.9
= control target key start
LH: loop header
LB: loop body
LE: loop exit
PB: predicated region body
PF: predicated region fallthrough
CT: control target
= control target key end

     0   :  { %s296_s0 = inlined_call_operand.vmem [shape: f32[16,128], index: 0, kind: input, shape index: {}]   ;;  %s297_s1 = inlined_call_operand.vmem [shape: f32[128,8], index: 1, kind: input, shape index: {}]   ;;  %s298_s2 = inlined_call_operand.vmem [shape: f32[1,8], index: 2, kind: input, shape index: {}]   ;;  %s299_s3 = inlined_call_operand.hbm [shape: f32[16,8], index: 3, kind: output, shape index: {}]  }
   0x1   :  { %v32_v0 = vld [vmem:[%s297_s1 + $0x78] sm:$0xff]  ;;  %v31_v1 = vld [vmem:[%s297_s1 + $0x70] sm:$0xff]  ;;  %v30_v2 = vld [vmem:[%s297_s1 + $0x68] sm:$0xff] }
   0x2   :  { %153 = vmatprep.subr.mxu0 %v32_v0  ;;  %v29_v3 = vld [vmem:[%s297_s1 + $0x60] sm:$0xff]  ;;  %v28_v5 = vld [vmem:[%s297_s1 + $0x58] sm:$0xff] }
   0x3   :  { %154 = vmatpush3.msra.mxu0 %v32_v0  ;;  %v15_v4 = vld [vmem:[%s296_s0] sm:$0xff] }
   0x4   :  { %155 = vmatprep.subr.mxu0 %v31_v1  ;;  %185 = vmatprep.mubr.f32.mxu0 %v15_v4 }
   0x5   :  { %156 = vmatpush3.msra.mxu0 %v31_v1 }
   0x6   :  { %157 = vmatprep.subr.mxu0 %v30_v2 }
   0x7   :  { %158 = vmatpush3.msra.mxu0 %v30_v2 }
   0x8   :  { %8 = vsyncpa [#allocation3], 0  ;;  %159 = vmatprep.subr.mxu0 %v29_v3  ;;  %v27_v6 = vld [vmem:[%s297_s1 + $0x50] sm:$0xff]  ;;  %v26_v7 = vld [vmem:[%s297_s1 + $0x48] sm:$0xff]  ;;  %s213_s23 = smov [#allocation2]   ;;  %vm115_vm0 = vcmask 64512  }
   0x9   :  { %160 = vmatpush3.msra.mxu0 %v29_v3  ;;  %v25_v8 = vld [vmem:[%s297_s1 + $0x40] sm:$0xff]  ;;  %v24_v9 = vld [vmem:[%s297_s1 + $0x38] sm:$0xff]  ;;  %v23_v10 = vld [vmem:[%s297_s1 + $0x30] sm:$0xff]  ;;  %s123_s24 = sshll.u32 %s213_s23, 4  ;;  %s124_s24 = int_to_ptr.vmem [resolvable:$true] %s123_s24 }
   0xa   :  { %161 = vmatprep.subr.mxu0 %v28_v5  ;;  %v22_v11 = vld [vmem:[%s297_s1 + $0x28] sm:$0xff]  ;;  %v21_v12 = vld [vmem:[%s297_s1 + $0x20] sm:$0xff]  ;;  %v20_v13 = vld [vmem:[%s297_s1 + $0x18] sm:$0xff]  ;;  %p196_p1 = scmp.lt.s32.totalorder %s124_s24, %s124_s24 }
   0xb   :  { %162 = vmatpush3.msra.mxu0 %v28_v5  ;;  %v19_v14 = vld [vmem:[%s297_s1 + $0x10] sm:$0xff]  ;;  %v18_v15 = vld [vmem:[%s297_s1 + $0x8] sm:$0xff]  ;;  %v17_v16 = vld [vmem:[%s297_s1] sm:$0xff]  ;;  %s191_s1 = scalar_lea.vmem %s124_s24, 256 }
   0xc   :  { %163 = vmatprep.subr.mxu0 %v27_v6  ;;  %v16_v17 = vld [vmem:[%s296_s0 + $0x8] sm:$0xff]  ;;  %v134_v18 = vld [vmem:[%s298_s2] ss:$0 sm:$0xff]  ;;  %p192_p0 = scmp.ne.s32.totalorder %s124_s24, %s191_s1  ;;  %p197_p2 = scmp.lt.s32.totalorder %s191_s1, %s191_s1 }
   0xd   :  { %164 = vmatpush3.msra.mxu0 %v27_v6 }
   0xe   :  { %165 = vmatprep.subr.mxu0 %v26_v7  ;;  %p198_p3 = por %p197_p2, %p196_p1 }
   0xf   :  { %166 = vmatpush3.msra.mxu0 %v26_v7 }
  0x10   :  { %167 = vmatprep.subr.mxu0 %v25_v8  ;;  %p199_p4 = pnand %p198_p3, %p192_p0 }
  0x11   :  { %168 = vmatpush3.msra.mxu0 %v25_v8 }
  0x12   :  { %169 = vmatprep.subr.mxu0 %v24_v9 }
  0x13   :  { %170 = vmatpush3.msra.mxu0 %v24_v9 }
  0x14   :  { %171 = vmatprep.subr.mxu0 %v23_v10 }
  0x15   :  { %172 = vmatpush3.msra.mxu0 %v23_v10 }
  0x16   :  { %173 = vmatprep.subr.mxu0 %v22_v11 }
  0x17   :  { %174 = vmatpush3.msra.mxu0 %v22_v11 }
  0x18   :  { %175 = vmatprep.subr.mxu0 %v21_v12 }
  0x19   :  { %176 = vmatpush3.msra.mxu0 %v21_v12 }
  0x1a   :  { %177 = vmatprep.subr.mxu0 %v20_v13 }
  0x1b   :  { %178 = vmatpush3.msra.mxu0 %v20_v13 }
  0x1c   :  { %179 = vmatprep.subr.mxu0 %v19_v14 }
  0x1d   :  { %180 = vmatpush3.msra.mxu0 %v19_v14 }
  0x1e   :  { %181 = vmatprep.subr.mxu0 %v18_v15 }
  0x1f   :  { %182 = vmatpush3.msra.mxu0 %v18_v15 }
  0x20   :  { %183 = vmatprep.subr.mxu0 %v17_v16 }
  0x21   :  { %184 = vmatpush3.msra.mxu0 %v17_v16 }
  0x22   :  { %186 = vmatmul.mubr.f32.vlgmr.msra.gmra.mxu0 %v16_v17 }
  0xe2   :  { %v187_v19 = vpop.f32.mrf.mxu0 }
  0xe3   :  { %v112_v20 = vadd.f32 %v187_v19, %v134_v18 }
  0xe4   :  { %v106_v21 = vpop.f32.mrf.mxu0 }
  0xe5   :  { %117 = vst.msk [vmem:[#allocation2 + $0x8] sm:$0xff] %vm115_vm0, %v112_v20  ;;  %v107_v22 = vadd.f32 %v134_v18, %v106_v21 }
  0xe7   :  { %116 = vst.msk [vmem:[#allocation2] sm:$0xff] %vm115_vm0, %v107_v22 }
  0xe8   :  { %202 = shalt.err (!%p199_p4)
}
  0xe9   :  { %s214_s0 = smov 128   ;;  %s215_s25 = smov 8  }
  0xea   :  { %129 = dma.vmem_to_hbm [thread:$0]  %s124_s24, 256, %s299_s3, [#allocation3], %s214_s0, %s214_s0, %s215_s25  }
  0xeb   :  { %211 = dma.done.wait [#allocation3], 256  }
  0xec   :  { %212 = vsyncadd [#allocation3], 4294967040 }
  0xed   :  { %133 = vsyncpa [#allocation3], 1 }

</bundles_post_ra>
